<compile_context>
chip_gen: v7x
topology: tpu7x:2x2x1
jax: 0.10.0
libtpu: 0.0.40
codegen_flags: <defaults>
</compile_context>

<pallas_src>
import functools
from dataclasses import dataclass

import jax
import jax.numpy as jnp
from jax.experimental import pallas as pl
from jax.experimental.pallas import tpu as pltpu

TOKEN_SELF_ATTN_VALUE = -5e4   # same constant as the PyTorch reference
MASK_VALUE = -1.0e38           # "minus huge" that stays finite even when summed
                               # with the additive chunk bias (no inf/NaN risk;
                               # exp(MASK_VALUE - m) == 0 for any m >= -5e4)


# ----------------------------- config ---------------------------------------
@dataclass
class CHBertConfig:
    bucket_size: int = 8
    n_hashes: int = 2
    causal: bool = False
    add_local_attn_hash: bool = False        # TODO(synk): local-attn hash branch not exercised
    random_rotations_per_head: bool = False
    layer_dropout: float = 0.0               # dropout is identity in eval / p=0
    lsh_dropout: float = 0.0
    return_attn: bool = False                # TODO(synk): scatter_add attention-return path omitted


# --------------------------- tiling helpers ----------------------------------
def _pick_group(C, W):
    """Chunks fused per super-tile; target key axis G*2W == 128 lanes (not 256)."""
    g = max(1, 128 // (2 * W))
    while g > 1 and C % g != 0:
        g -= 1
    return g


def _tpu_vmem_capacity_bytes():
    """Generation-aware VMEM capacity (v7x: 64 MiB, v5e/v6e: 128 MiB)."""
    try:
        info = pltpu.get_tpu_info()
        for attr in ("vmem_capacity_bytes", "vmem_size_bytes", "vmem_bytes"):
            cap = getattr(info, attr, None)
            if cap:
                return int(cap)
    except Exception:
        pass
    return 128 * 1024 * 1024


def _pick_super_batch(NS, QL, KL, D, budget_bytes):
    """Super-tiles per grid step, budgeted against the real per-step footprint:
    double-buffered streamed inputs/outputs + ~4x f32 score-tile temporaries."""
    per_tile = (
        2 * (2 * QL * D            # q  bf16 (double-buffered)
             + 2 * (2 * KL * D)    # k,v bf16
             + 4 * QL              # qt  i32
             + 4 * KL              # kvt i32
             + 2 * QL * D          # bo  bf16
             + 4 * QL)             # lse f32
        + 4 * (QL * KL * 4)        # dots / p_un / exp+mask f32 temporaries
    )
    s = max(1, min(NS, budget_bytes // max(per_tile, 1)))
    while s > 1 and NS % s != 0:
        s -= 1
    return s


# --------------------------- Pallas kernel ----------------------------------
def _lsh_supertile_attn_kernel(bq_ref, bk_ref, bv_ref, qt_ref, kvt_ref, bias_ref,
                               o_ref, lse_ref, *, scale, causal, query_len, lse_2d):
    # blocks: bq (1,S,QL,D) bf16 | bk/bv (1,S,KL,D) bf16 | qt (1,S,QL,1) i32
    #         kvt (1,S,1,KL) i32 | bias (1,1,QL,KL) f32 (grid-constant)
    #         o (1,S,QL,D) bf16  | lse (1,S,QL) f32 (or (1,S,QL,1) fallback)
    q = bq_ref[0] * scale      # scale on the small (S,QL,D) tensor, in-kernel
    k = bk_ref[0]              # (S, KL, D) L2-normalized
    v = bv_ref[0]              # (S, KL, D)
    qt = qt_ref[0]             # (S, QL, 1) query time indices
    kvt = kvt_ref[0]           # (S, 1, KL) key/value time indices

    # scores for all G fused chunks at once — lane-dense (KL == 128)
    dots = jnp.einsum('sqd,skd->sqk', q, k,
                      preferred_element_type=jnp.float32)       # (S,QL,KL) f32

    if causal:
        # mirrors torch: bq_t < bkv_t.clamp(max=query_len - 1)
        dots = jnp.where(qt < jnp.minimum(kvt, query_len - 1), MASK_VALUE, dots)

    # self-attention positions get TOKEN_SELF_ATTN_VALUE
    dots = jnp.where(qt == kvt, TOKEN_SELF_ATTN_VALUE, dots)

    # block-diagonal chunk gating as a single additive bias, applied LAST so it
    # also squashes any cross-chunk self/causal fills (matches per-chunk ref).
    dots = dots + bias_ref[0]                                   # (1,QL,KL) bcast

    # single-exp softmax; normalization happens on the (S,QL,D) output instead
    # of the (S,QL,KL) score tile.
    m = jnp.max(dots, axis=-1, keepdims=True)                   # (S,QL,1)
    p_un = jnp.exp(dots - m)
    denom = jnp.sum(p_un, axis=-1, keepdims=True)               # (S,QL,1)

    bo = jnp.einsum('sqk,skd->sqd', p_un.astype(v.dtype), v,
                    preferred_element_type=jnp.float32)         # (S,QL,D) f32
    # NOTE: approx=False gives exact normalization (bit-parity) at negligible cost.
    bo = bo * pl.reciprocal(denom, approx=True)
    lse = m + jnp.log(denom)                                    # (S,QL,1)

    o_ref[0] = bo.astype(o_ref.dtype)
    if lse_2d:
        lse_ref[0] = jnp.squeeze(lse, axis=-1).astype(lse_ref.dtype)   # (S,QL)
    else:
        lse_ref[0] = lse.astype(lse_ref.dtype)                          # (S,QL,1)


def lsh_chunk_attention(bq, bk, bv, bq_t, bkv_t, *, causal, query_len):
    """Per-chunk LSH attention.  bq: (B,C,W,D), bk/bv: (B,C,2W,D)."""
    B, C, W, D = bq.shape
    W2 = bk.shape[2]                         # 2W
    G = _pick_group(C, W)                    # chunks fused per super-tile
    NS = C // G                              # super-tiles per batch row
    QL, KL = G * W, G * W2
    scale = float(D) ** -0.5

    # generation-aware VMEM sizing (v7x has half the VMEM of v5e/v6e)
    vmem_cap = _tpu_vmem_capacity_bytes()
    scoped_vmem = int(min(vmem_cap // 2, 64 * 1024 * 1024))
    S = _pick_super_batch(NS, QL, KL, D, scoped_vmem // 2)
    # lane-dense lse store only when the (1,S,QL) block is tiling-legal
    lse_2d = (S == NS) or (S % 8 == 0)

    compute_dtype = jnp.bfloat16
    bq_s = bq.reshape(B, NS, QL, D).astype(compute_dtype)
    bk_s = bk.reshape(B, NS, KL, D).astype(compute_dtype)
    bv_s = bv.reshape(B, NS, KL, D).astype(compute_dtype)
    qt_s = bq_t.astype(jnp.int32).reshape(B, NS, QL, 1)
    kvt_s = bkv_t.astype(jnp.int32).reshape(B, NS, 1, KL)

    # grid-constant additive block-diagonal chunk bias (DMA'd once)
    qc = (jnp.arange(QL, dtype=jnp.int32) // W).reshape(QL, 1)
    kc = (jnp.arange(KL, dtype=jnp.int32) // W2).reshape(1, KL)
    chunk_bias = jnp.where(qc == kc, 0.0, MASK_VALUE).astype(jnp.float32)
    chunk_bias = chunk_bias.reshape(1, 1, QL, KL)

    kernel = functools.partial(_lsh_supertile_attn_kernel, scale=scale,
                               causal=causal, query_len=query_len, lse_2d=lse_2d)
    im4 = lambda i, j: (i, j, 0, 0)
    im_bias = lambda i, j: (0, 0, 0, 0)

    if lse_2d:
        lse_shape = jax.ShapeDtypeStruct((B, NS, QL), jnp.float32)
        lse_spec = pl.BlockSpec((1, S, QL), lambda i, j: (i, j, 0))
    else:
        lse_shape = jax.ShapeDtypeStruct((B, NS, QL, 1), jnp.float32)
        lse_spec = pl.BlockSpec((1, S, QL, 1), im4)

    # grid = (B, NS//S); B typically folds batch*heads so both v7x TensorCores
    # get work along the leading "parallel" axis.
    bo, lse = pl.pallas_call(
        kernel,
        out_shape=(jax.ShapeDtypeStruct((B, NS, QL, D), compute_dtype), lse_shape),
        grid=(B, NS // S),
        in_specs=[pl.BlockSpec((1, S, QL, D), im4),
                  pl.BlockSpec((1, S, KL, D), im4),
                  pl.BlockSpec((1, S, KL, D), im4),
                  pl.BlockSpec((1, S, QL, 1), im4),
                  pl.BlockSpec((1, S, 1, KL), im4),
                  pl.BlockSpec((1, 1, QL, KL), im_bias)],
        out_specs=(pl.BlockSpec((1, S, QL, D), im4), lse_spec),
        compiler_params=pltpu.CompilerParams(
            dimension_semantics=("parallel", "parallel"),
            vmem_limit_bytes=scoped_vmem),
    )(bq_s, bk_s, bv_s, qt_s, kvt_s, chunk_bias)
    return bo, lse


# ------------------------------ JAX glue -------------------------------------
def sort_key_val(t1, t2):
    perm = jnp.argsort(t1, axis=-1)
    return jnp.take_along_axis(t1, perm, axis=-1), jnp.take_along_axis(t2, perm, axis=-1)


def batched_index_select(values, indices):
    # values: (B, T, D) or (B, T); indices: (B, N)
    if values.ndim == 3:
        return jnp.take_along_axis(values, indices[..., None], axis=1)
    return jnp.take_along_axis(values, indices, axis=1)


def look_one_back(x):
    # TODO(synk): v5e DMA-dedup — stream un-duplicated k/v with an overlapping
    #             (G+1)-chunk BlockSpec window instead of materializing this 2x copy.
    x_extra = jnp.concatenate([x[:, -1:, ...], x[:, :-1, ...]], axis=1)
    return jnp.concatenate([x, x_extra], axis=2)


def hash_vectors(rng, n_buckets, vecs, config: CHBertConfig):
    """Deterministic (seeded) replacement for torch.randn rotation hashing."""
    B, T, F = vecs.shape
    assert n_buckets % 2 == 0
    rot_shape = (B if config.random_rotations_per_head else 1,
                 F, config.n_hashes, n_buckets // 2)
    random_rotations = jax.random.normal(rng, rot_shape, dtype=vecs.dtype)
    # dropout_for_hash is identity (p=0 / eval)
    rotated = jnp.einsum('btf,bfhi->bhti', vecs, random_rotations)
    rotated = jnp.concatenate([rotated, -rotated], axis=-1)
    buckets = jnp.argmax(rotated, axis=-1)                    # (B, n_hashes, T)
    offsets = (jnp.arange(config.n_hashes) * n_buckets).reshape(1, -1, 1)
    return jnp.reshape(buckets + offsets, (B, -1))            # (B, n_hashes*T)


def chbert_attention_head_forward(qk, v, rng, config: CHBertConfig, query_len=None):
    B, T, D = qk.shape
    query_len = T if query_len is None else query_len
    assert T % (config.bucket_size * 2) == 0
    n_buckets = T // config.bucket_size

    buckets = hash_vectors(rng, n_buckets, qk, config)         # (B, n_hashes*T)
    total_hashes = config.n_hashes + int(config.add_local_attn_hash)

    ticker = jnp.broadcast_to(jnp.arange(total_hashes * T)[None, :],
                              (B, total_hashes * T))
    buckets_and_t = T * buckets + (ticker % T)

    sbuckets_and_t, sticker = sort_key_val(buckets_and_t, ticker)
    _, undo_sort = sort_key_val(sticker, ticker)

    st = sticker % T
    # TODO(synk): do this sorted gather in-kernel via scalar prefetch to avoid
    #             the HBM round trip of the sorted tensors (v5e bandwidth win).
    sqk = batched_index_select(qk, st)
    sv = batched_index_select(v, st)

    chunk_size = total_hashes * n_buckets
    W = (total_hashes * T) // chunk_size                       # == bucket_size
    bq_t = st.reshape(B, chunk_size, W)
    bkv_t = bq_t
    bqk = sqk.reshape(B, chunk_size, W, D)
    bv = sv.reshape(B, chunk_size, W, D)

    bq = bqk
    norm = jnp.sqrt(jnp.sum(bqk * bqk, axis=-1, keepdims=True))
    bk = (bqk / jnp.maximum(norm, 1e-12)).astype(bq.dtype)     # F.normalize(p=2)

    bk = look_one_back(bk)
    bv = look_one_back(bv)
    bkv_t = look_one_back(bkv_t)

    # ---- Pallas hot path: fused per-chunk masked attention ----
    bo, lse = lsh_chunk_attention(bq, bk, bv, bq_t, bkv_t,
                                  causal=config.causal, query_len=query_len)

    # TODO(synk): bo is bf16 here (bandwidth); reference keeps f32 through unsorting.
    so = bo.reshape(B, -1, D)
    slogits = lse.reshape(B, -1)                               # f32

    # unsort (UnsortLogits.forward semantics)
    o = batched_index_select(so, undo_sort)
    logits = jnp.take_along_axis(slogits, undo_sort, axis=-1)

    o = o.reshape(B, total_hashes, T, D)
    logits = logits.reshape(B, total_hashes, T, 1)
    if query_len != T:
        o = o[:, :, :query_len]
        logits = logits[:, :, :query_len]

    lse_h = jax.scipy.special.logsumexp(logits, axis=1, keepdims=True)
    probs = jnp.exp(logits - lse_h)
    out = jnp.sum(o.astype(jnp.float32) * probs, axis=1)       # (B, query_len, D)
    out = out.astype(qk.dtype)

    attn = jnp.zeros((0,), dtype=qk.dtype)                     # return_attn=False
    return out, attn, buckets


# ------------------------------- demo ----------------------------------------
if __name__ == "__main__":
    config = CHBertConfig(bucket_size=8, n_hashes=2, causal=False)

    batch, seq_len, dim = 2, 64, 32
    key = jax.random.PRNGKey(0)
    k_qk, k_v, k_rot = jax.random.split(key, 3)
    qk = jax.random.normal(k_qk, (batch, seq_len, dim), dtype=jnp.float32)
    v = jax.random.normal(k_v, (batch, seq_len, dim), dtype=jnp.float32)

    out, attn, buckets = chbert_attention_head_forward(qk, v, k_rot, config)
    out = jax.block_until_ready(out)

    assert out.shape == (batch, seq_len, dim)
    assert buckets.shape == (batch, config.n_hashes * seq_len)
    assert bool(jnp.all(jnp.isfinite(out)))
    print("KERNEL_OK")
</pallas_src>

<mosaic_0001>
module attributes {stable_mosaic.version = 11 : i64} {
  func.func @_lsh_supertile_attn_kernel(%arg0: i32, %arg1: i32, %arg2: memref<1x2x64x32xbf16, #tpu.memory_space<vmem>>, %arg3: memref<1x2x128x32xbf16, #tpu.memory_space<vmem>>, %arg4: memref<1x2x128x32xbf16, #tpu.memory_space<vmem>>, %arg5: memref<1x2x64x1xi32, #tpu.memory_space<vmem>>, %arg6: memref<1x2x1x128xi32, #tpu.memory_space<vmem>>, %arg7: memref<1x1x64x128xf32, #tpu.memory_space<vmem>>, %arg8: memref<1x2x64x32xbf16, #tpu.memory_space<vmem>>, %arg9: memref<1x2x64xf32, #tpu.memory_space<vmem>>) attributes {dimension_semantics = [#tpu.dimension_semantics<parallel>, #tpu.dimension_semantics<parallel>], iteration_bounds = array<i64: 2, 1>, scalar_prefetch = 0 : i64, scratch_operands = 0 : i64, tpu.core_type = #tpu.core_type<tc>, window_params = [{transform_indices = @transform_0, window_bounds = array<i64: 1, 2, 64, 32>}, {transform_indices = @transform_1, window_bounds = array<i64: 1, 2, 128, 32>}, {transform_indices = @transform_2, window_bounds = array<i64: 1, 2, 128, 32>}, {transform_indices = @transform_3, window_bounds = array<i64: 1, 2, 64, 1>}, {transform_indices = @transform_4, window_bounds = array<i64: 1, 2, 1, 128>}, {pipeline_mode = #tpu.pipeline_mode<synchronous>, transform_indices = @transform_5, window_bounds = array<i64: 1, 1, 64, 128>}, {transform_indices = @transform_6, window_bounds = array<i64: 1, 2, 64, 32>}, {transform_indices = @transform_7, window_bounds = array<i64: 1, 2, 64>}]} {
    %c0 = arith.constant 0 : index
    %c0_0 = arith.constant 0 : index
    %c0_1 = arith.constant 0 : index
    %c0_2 = arith.constant 0 : index
    %0 = vector.load %arg2[%c0, %c0_0, %c0_1, %c0_2] : memref<1x2x64x32xbf16, #tpu.memory_space<vmem>>, vector<1x2x64x32xbf16>
    %1 = vector.shape_cast %0 : vector<1x2x64x32xbf16> to vector<2x64x32xbf16>
    %cst = arith.constant 1.767580e-01 : bf16
    %2 = vector.broadcast %cst : bf16 to vector<2x64x32xbf16>
    %3 = arith.mulf %1, %2 : vector<2x64x32xbf16>
    %c0_3 = arith.constant 0 : index
    %c0_4 = arith.constant 0 : index
    %c0_5 = arith.constant 0 : index
    %c0_6 = arith.constant 0 : index
    %4 = vector.load %arg3[%c0_3, %c0_4, %c0_5, %c0_6] : memref<1x2x128x32xbf16, #tpu.memory_space<vmem>>, vector<1x2x128x32xbf16>
    %5 = vector.shape_cast %4 : vector<1x2x128x32xbf16> to vector<2x128x32xbf16>
    %c0_7 = arith.constant 0 : index
    %c0_8 = arith.constant 0 : index
    %c0_9 = arith.constant 0 : index
    %c0_10 = arith.constant 0 : index
    %6 = vector.load %arg4[%c0_7, %c0_8, %c0_9, %c0_10] : memref<1x2x128x32xbf16, #tpu.memory_space<vmem>>, vector<1x2x128x32xbf16>
    %7 = vector.shape_cast %6 : vector<1x2x128x32xbf16> to vector<2x128x32xbf16>
    %c0_11 = arith.constant 0 : index
    %c0_12 = arith.constant 0 : index
    %c0_13 = arith.constant 0 : index
    %c0_14 = arith.constant 0 : index
    %8 = vector.load %arg5[%c0_11, %c0_12, %c0_13, %c0_14] : memref<1x2x64x1xi32, #tpu.memory_space<vmem>>, vector<1x2x64x1xi32>
    %9 = vector.shape_cast %8 : vector<1x2x64x1xi32> to vector<2x64x1xi32>
    %c0_15 = arith.constant 0 : index
    %c0_16 = arith.constant 0 : index
    %c0_17 = arith.constant 0 : index
    %c0_18 = arith.constant 0 : index
    %10 = vector.load %arg6[%c0_15, %c0_16, %c0_17, %c0_18] : memref<1x2x1x128xi32, #tpu.memory_space<vmem>>, vector<1x2x1x128xi32>
    %11 = vector.shape_cast %10 : vector<1x2x1x128xi32> to vector<2x1x128xi32>
    "tpu.trace_start"() <{level = 10 : i32, message = "sqd,skd->sqk"}> : () -> ()
    %cst_19 = arith.constant dense<0.000000e+00> : vector<2x64x128xf32>
    %12 = tpu.matmul %3, %5, %cst_19 {dimension_numbers = #tpu.dot_dimension_numbers<[2], [2], [1], [1], [0, 0, 0, 1, 1, 1], [0], [0]>} : vector<2x64x32xbf16>, vector<2x128x32xbf16>, vector<2x64x128xf32> -> vector<2x64x128xf32>
    "tpu.trace_stop"() : () -> ()
    %13 = vector.broadcast %9 : vector<2x64x1xi32> to vector<2x64x128xi32>
    %14 = vector.broadcast %11 : vector<2x1x128xi32> to vector<2x64x128xi32>
    %15 = arith.cmpi eq, %13, %14 : vector<2x64x128xi32>
    %cst_20 = arith.constant -5.000000e+04 : f32
    %16 = vector.broadcast %cst_20 : f32 to vector<2x64x128xf32>
    %17 = arith.select %15, %16, %12 : vector<2x64x128xi1>, vector<2x64x128xf32>
    %c0_21 = arith.constant 0 : index
    %c0_22 = arith.constant 0 : index
    %c0_23 = arith.constant 0 : index
    %c0_24 = arith.constant 0 : index
    %18 = vector.load %arg7[%c0_21, %c0_22, %c0_23, %c0_24] : memref<1x1x64x128xf32, #tpu.memory_space<vmem>>, vector<1x1x64x128xf32>
    %19 = vector.shape_cast %18 : vector<1x1x64x128xf32> to vector<1x64x128xf32>
    %20 = vector.broadcast %19 : vector<1x64x128xf32> to vector<2x64x128xf32>
    %21 = arith.addf %17, %20 : vector<2x64x128xf32>
    %cst_25 = arith.constant dense<0xFF800000> : vector<2x64xf32>
    %22 = vector.multi_reduction <maximumf>, %21, %cst_25 [2] : vector<2x64x128xf32> to vector<2x64xf32>
    %23 = vector.shape_cast %22 : vector<2x64xf32> to vector<2x64x1xf32>
    %24 = vector.broadcast %23 : vector<2x64x1xf32> to vector<2x64x128xf32>
    %25 = arith.subf %21, %24 : vector<2x64x128xf32>
    %26 = math.exp %25 : vector<2x64x128xf32>
    %cst_26 = arith.constant dense<0.000000e+00> : vector<2x64xf32>
    %27 = vector.multi_reduction <add>, %26, %cst_26 [2] : vector<2x64x128xf32> to vector<2x64xf32>
    %28 = vector.shape_cast %27 : vector<2x64xf32> to vector<2x64x1xf32>
    %29 = arith.truncf %26 : vector<2x64x128xf32> to vector<2x64x128xbf16>
    "tpu.trace_start"() <{level = 10 : i32, message = "sqk,skd->sqd"}> : () -> ()
    %cst_27 = arith.constant dense<0.000000e+00> : vector<2x64x32xf32>
    %30 = tpu.matmul %29, %7, %cst_27 {dimension_numbers = #tpu.dot_dimension_numbers<[2], [1], [1], [2], [0, 0, 0, 1, 1, 2], [0], [0]>} : vector<2x64x128xbf16>, vector<2x128x32xbf16>, vector<2x64x32xf32> -> vector<2x64x32xf32>
    "tpu.trace_stop"() : () -> ()
    %31 = tpu.reciprocal %28 {approx = true} : vector<2x64x1xf32> -> vector<2x64x1xf32>
    %32 = vector.broadcast %31 : vector<2x64x1xf32> to vector<2x64x32xf32>
    %33 = arith.mulf %30, %32 : vector<2x64x32xf32>
    %34 = math.log %28 : vector<2x64x1xf32>
    %35 = arith.addf %23, %34 : vector<2x64x1xf32>
    %36 = arith.truncf %33 : vector<2x64x32xf32> to vector<2x64x32xbf16>
    %c0_28 = arith.constant 0 : index
    %c0_29 = arith.constant 0 : index
    %c0_30 = arith.constant 0 : index
    %c0_31 = arith.constant 0 : index
    %37 = vector.load %arg8[%c0_28, %c0_29, %c0_30, %c0_31] : memref<1x2x64x32xbf16, #tpu.memory_space<vmem>>, vector<1x2x64x32xbf16>
    %38 = vector.shape_cast %37 : vector<1x2x64x32xbf16> to vector<2x64x32xbf16>
    %39 = vector.shape_cast %36 : vector<2x64x32xbf16> to vector<1x2x64x32xbf16>
    tpu.vector_store %arg8[%c0_28, %c0_29, %c0_30, %c0_31], %39 {strides = array<i32>} : memref<1x2x64x32xbf16, #tpu.memory_space<vmem>>, vector<1x2x64x32xbf16>,
    %40 = vector.shape_cast %35 : vector<2x64x1xf32> to vector<2x64xf32>
    %c0_32 = arith.constant 0 : index
    %c0_33 = arith.constant 0 : index
    %c0_34 = arith.constant 0 : index
    %41 = vector.load %arg9[%c0_32, %c0_33, %c0_34] : memref<1x2x64xf32, #tpu.memory_space<vmem>>, vector<1x2x64xf32>
    %42 = vector.shape_cast %41 : vector<1x2x64xf32> to vector<2x64xf32>
    %43 = vector.shape_cast %40 : vector<2x64xf32> to vector<1x2x64xf32>
    tpu.vector_store %arg9[%c0_32, %c0_33, %c0_34], %43 {strides = array<i32>} : memref<1x2x64xf32, #tpu.memory_space<vmem>>, vector<1x2x64xf32>,
    return
  }
  func.func @transform_0(%arg0: i32, %arg1: i32) -> (i32, i32, i32, i32) {
    %c0_i32 = arith.constant 0 : i32
    %c0_i32_0 = arith.constant 0 : i32
    %c0_i32_1 = arith.constant 0 : i32
    return %arg0, %arg1, %c0_i32, %c0_i32_0 : i32, i32, i32, i32
  }
  func.func @transform_1(%arg0: i32, %arg1: i32) -> (i32, i32, i32, i32) {
    %c0_i32 = arith.constant 0 : i32
    %c0_i32_0 = arith.constant 0 : i32
    %c0_i32_1 = arith.constant 0 : i32
    return %arg0, %arg1, %c0_i32, %c0_i32_0 : i32, i32, i32, i32
  }
  func.func @transform_2(%arg0: i32, %arg1: i32) -> (i32, i32, i32, i32) {
    %c0_i32 = arith.constant 0 : i32
    %c0_i32_0 = arith.constant 0 : i32
    %c0_i32_1 = arith.constant 0 : i32
    return %arg0, %arg1, %c0_i32, %c0_i32_0 : i32, i32, i32, i32
  }
  func.func @transform_3(%arg0: i32, %arg1: i32) -> (i32, i32, i32, i32) {
    %c0_i32 = arith.constant 0 : i32
    %c0_i32_0 = arith.constant 0 : i32
    %c0_i32_1 = arith.constant 0 : i32
    return %arg0, %arg1, %c0_i32, %c0_i32_0 : i32, i32, i32, i32
  }
  func.func @transform_4(%arg0: i32, %arg1: i32) -> (i32, i32, i32, i32) {
    %c0_i32 = arith.constant 0 : i32
    %c0_i32_0 = arith.constant 0 : i32
    %c0_i32_1 = arith.constant 0 : i32
    return %arg0, %arg1, %c0_i32, %c0_i32_0 : i32, i32, i32, i32
  }
  func.func @transform_5(%arg0: i32, %arg1: i32) -> (i32, i32, i32, i32) {
    %c0_i32 = arith.constant 0 : i32
    %c0_i32_0 = arith.constant 0 : i32
    %c0_i32_1 = arith.constant 0 : i32
    %c0_i32_2 = arith.constant 0 : i32
    %c0_i32_3 = arith.constant 0 : i32
    return %c0_i32, %c0_i32_0, %c0_i32_1, %c0_i32_2 : i32, i32, i32, i32
  }
  func.func @transform_6(%arg0: i32, %arg1: i32) -> (i32, i32, i32, i32) {
    %c0_i32 = arith.constant 0 : i32
    %c0_i32_0 = arith.constant 0 : i32
    %c0_i32_1 = arith.constant 0 : i32
    return %arg0, %arg1, %c0_i32, %c0_i32_0 : i32, i32, i32, i32
  }
  func.func @transform_7(%arg0: i32, %arg1: i32) -> (i32, i32, i32) {
    %c0_i32 = arith.constant 0 : i32
    %c0_i32_0 = arith.constant 0 : i32
    return %arg0, %arg1, %c0_i32 : i32, i32, i32
  }
}

</mosaic_0001>

<bundles_post_ra>
// kernel: tpu_custom_call.1
= control target key start
LH: loop header
LB: loop body
LE: loop exit
PB: predicated region body
PF: predicated region fallthrough
CT: control target
= control target key end

     0   :  { %s3674_s0 = inlined_call_operand.hbm [shape: bf16[2,2,64,32], index: 0, kind: input, shape index: {}]   ;;  %s3675_s1 = inlined_call_operand.hbm [shape: bf16[2,2,128,32], index: 1, kind: input, shape index: {}]   ;;  %s3676_s2 = inlined_call_operand.hbm [shape: bf16[2,2,128,32], index: 2, kind: input, shape index: {}]   ;;  %s3677_s3 = inlined_call_operand.hbm [shape: s32[2,2,64,1], index: 3, kind: input, shape index: {}]   ;;  %s3678_s4 = inlined_call_operand.hbm [shape: s32[2,2,1,128], index: 4, kind: input, shape index: {}]   ;;  %s3679_s5 = inlined_call_operand.hbm [shape: f32[1,1,64,128], index: 5, kind: input, shape index: {}]   ;;  %s3680_s6 = inlined_call_operand.hbm [shape: bf16[2,2,64,32], index: 6, kind: output, shape index: {0}]   ;;  %s3681_s7 = inlined_call_operand.hbm [shape: f32[2,2,64], index: 7, kind: output, shape index: {1}]  }
   0x1   :  { %3709 = sst [smem:[#allocation30_spill]] %s3675_s1 }
   0x2   :  { %3710 = sst [smem:[#allocation31_spill]] %s3677_s3 }
   0x3   :  { %3711 = sst [smem:[#allocation32_spill]] %s3680_s6 }
   0x4   :  { %3712 = sst [smem:[#allocation33_spill]] %s3681_s7 }
   0x5   :  { %13 = vsyncpa [#allocation3], 0 }
   0x6   :  { %15 = vsyncpa [#allocation3 + $0x1], 0 }
   0x7   :  { %16 = vsyncpa [#allocation6], 0 }
   0x8   :  { %18 = vsyncpa [#allocation6 + $0x1], 0 }
   0x9   :  { %19 = vsyncpa [#allocation9], 0 }
   0xa   :  { %21 = vsyncpa [#allocation9 + $0x1], 0 }
   0xb   :  { %22 = vsyncpa [#allocation12], 0 }
   0xc   :  { %23 = vsyncpa [#allocation4], 0 }
   0xd   :  { %25 = vsyncpa [#allocation4 + $0x1], 0 }
   0xe   :  { %26 = vsyncpa [#allocation15], 0 }
   0xf   :  { %28 = vsyncpa [#allocation15 + $0x1], 0  ;;  %s2844_s24 = smov 0   ;;  %s2846_s25 = smov 0  }
  0x10   :  { %s2848_s26 = smov 0   ;;  %s2850_s27 = smov 0  }
  0x11   :  { %s2852_s28 = smov 0   ;;  %s2854_s29 = smov 0  }
  0x12 LB: > { %3713 = sst [smem:[#allocation22_spill]] %s2765_s24  ;;  %s46_s30 = sadd.s32 1, %s2781_s28  ;;  %s2785_s29 = sphi %s2854_s29, %s34_s29   ;;  %s2781_s28 = sphi %s2852_s28, %s3758_s28   ;;  %s2777_s27 = sphi %s2850_s27, %s3757_s27   ;;  %s2773_s26 = sphi %s2848_s26, %s3753_s26   ;;  %s2769_s25 = sphi %s2846_s25, %s3756_s25   ;;  %s2765_s24 = sphi %s2844_s24, %s3755_s24  }
  0x13   : > { %3714 = sst [smem:[#allocation23_spill]] %s2773_s26  ;;  %s55_s8 = sadd.s32 1, %s2773_s26 }
  0x14   : > { %3715 = sst [smem:[#allocation24_spill]] %s2777_s27  ;;  %p48_p0 = scmp.ge.s32.totalorder %s46_s30, 2 }
  0x15   : > { %3716 = sst [smem:[#allocation25_spill]] %s2785_s29  ;;  %p3683_p1 = scmp.ne.s32.totalorder %s2773_s26, %s2769_s25 }
  0x16   : > { %p63_p2 = scmp.eq.s32.totalorder %s2785_s29, 0  ;;  %s3760_s30 = smov (%p48_p0, %s46_s30), 0 }
  0x17   : > { %3717 = sst [smem:[#allocation26_spill]] %s3760_s30  ;;  %p2290_p5 = scmp.lt.s32.totalorder %s2785_s29, 2 }
  0x18   : > { %p64_p4 = por %p63_p2, %p3683_p1  ;;  %s50_s9 = ssub.s32 %s2781_s28, %s3760_s30 }
  0x19   : > { %s2889_s10 = sand.u32 1, %s2773_s26   ;;  %p53_p6 = scmp.eq.s32.totalorder %s50_s9, 0 }
  0x1a   : > { %p2891_p7 = pnand %p2290_p5, %p64_p4  ;;  %s3682_s13 = sand.u32 1, %s2785_s29  }
  0x1b   : > { %s2896_s12 = scalar_select %p53_p6, %s2773_s26, %s55_s8  }
  0x1c   : > { %s3718_s11 = scalar_select %p2891_p7, 1, 0 }
  0x1d   : > { %3719 = sst [smem:[#allocation27_spill]] %s2896_s12  ;;  %s2900_s14 = sshll.u32 %s2889_s10, 7 }
  0x1e   : > { %s2903_s15 = sshll.u32 %s2781_s28, 11  ;;  %s3720_s1 = sld [smem:[#allocation30_spill]] }
  0x1f   : > { %s322_s19 = scalar_lea.vmem [#allocation5], %s2900_s14  ;;  %s2916_s21 = scalar_lea.sflag [#allocation6], %s3682_s13 }
  0x20   : > { %s332_s20 = sshll.u32 %s322_s19, 4  ;;  %p2922_p9 = pneg %p2891_p7  ;;  %s2912_s20 = int_to_ptr.vmem [resolvable:$true] %s332_s20 }
  0x22   : > { %s3721_s23 = scalar_select %p2922_p9, 1, 0 }
  0x24   : > { %s2909_s18 = scalar_lea.hbm %s3720_s1, %s2903_s15  ;;  %s2486_s16 = scalar_lea.hbm %s3720_s1, 4096 }
  0x25   : > { %s2481_s22 = scalar_lea.hbm %s2909_s18, 2048  ;;  %p2487_p12 = scmp.lt.u32.totalorder %s2909_s18, %s3720_s1 }
  0x26   : > { %p2482_p8 = scmp.ne.s32.totalorder %s2909_s18, %s2481_s22  ;;  %p2488_p13 = scmp.lt.u32.totalorder %s2486_s16, %s2481_s22 }
  0x27   : > { %p2490_p2 = scmp.lt.u32.totalorder %s2481_s22, %s2909_s18 }
  0x28   : > { %p2484_p10 = pnand %p2922_p9, %p2482_p8  ;;  %p2489_p0 = por %p2488_p13, %p2487_p12 }
  0x2a   : > { %p2485_p11 = pneg %p2484_p10  ;;  %p2491_p4 = por %p2490_p2, %p2489_p0 }
  0x2c   : > { %p2492_p5 = pnand %p2491_p4, %p2485_p11 }
  0x2e   : > { %2495 = shalt.err (!%p2492_p5)
}
  0x2f   : > { %s2496_s13 = scalar_lea.vmem %s2912_s20, 2048  ;;  %s2787_s8 = smov [#allocation5]  }
  0x30   : > { %p2497_p6 = scmp.ne.s32.totalorder %s2912_s20, %s2496_s13  ;;  %s2501_s9 = sshll.u32 %s2787_s8, 4  ;;  %s2502_s9 = int_to_ptr.vmem [resolvable:$false] %s2501_s9 }
  0x31   : > { %s2503_s17 = scalar_lea.vmem %s2502_s9, 4096  ;;  %p2504_p3 = scmp.lt.s32.totalorder %s2912_s20, %s2502_s9 }
  0x32   : > { %p2499_p8 = pnand %p2497_p6, %p2922_p9  ;;  %p2505_p1 = scmp.lt.s32.totalorder %s2503_s17, %s2496_s13 }
  0x34   : > { %p2500_p10 = pneg %p2499_p8  ;;  %p2506_p12 = por %p2505_p1, %p2504_p3 }
  0x36   : > { %p2507_p13 = pnand %p2506_p12, %p2500_p10 }
  0x38   : > { %2510 = shalt.err (!%p2507_p13)
}
  0x39   : > { %s3685_s22 = smov 64   ;;  %s3687_s16 = smov 4  }
  0x3a   : > { %2272 = dma.hbm_to_vmem [thread:$0]  (!%p2891_p7), %s2909_s18, 2048, %s2912_s20, %s2916_s21, %s3685_s22, %s3685_s22, %s3687_s16  }
  0x3b   : > { %s3722_s3 = sld [smem:[#allocation31_spill]]  ;;  %s370_s9 = scalar_lea.vmem [#allocation8], %s2900_s14 }
  0x3c   : > { %s380_s17 = sshll.u32 %s370_s9, 4  ;;  %s3723_s1 = sand.u32 1, %s2785_s29   ;;  %s2956_s17 = int_to_ptr.vmem [resolvable:$true] %s380_s17 }
  0x3d   : > { %s2960_s30 = scalar_lea.sflag [#allocation9], %s3723_s1 }
  0x41   : > { %s2953_s8 = scalar_lea.hbm %s3722_s3, %s2903_s15  ;;  %s2516_s19 = scalar_lea.hbm %s3722_s3, 4096 }
  0x42   : > { %s2511_s12 = scalar_lea.hbm %s2953_s8, 2048  ;;  %p2517_p0 = scmp.lt.u32.totalorder %s2953_s8, %s3722_s3 }
  0x43   : > { %p2512_p1 = scmp.ne.s32.totalorder %s2953_s8, %s2511_s12  ;;  %p2518_p2 = scmp.lt.u32.totalorder %s2516_s19, %s2511_s12 }
  0x44   : > { %p2520_p5 = scmp.lt.u32.totalorder %s2511_s12, %s2953_s8 }
  0x45   : > { %p2514_p3 = pnand %p2512_p1, %p2922_p9  ;;  %p2519_p4 = por %p2518_p2, %p2517_p0 }
  0x47   : > { %p2515_p11 = pneg %p2514_p3  ;;  %p2521_p6 = por %p2520_p5, %p2519_p4 }
  0x49   : > { %p2522_p8 = pnand %p2521_p6, %p2515_p11 }
  0x4b   : > { %2525 = shalt.err (!%p2522_p8)
}
  0x4c   : > { %s2526_s1 = scalar_lea.vmem %s2956_s17, 2048  ;;  %s2790_s9 = smov [#allocation8]  }
  0x4d   : > { %p2527_p10 = scmp.ne.s32.totalorder %s2956_s17, %s2526_s1  ;;  %s2531_s18 = sshll.u32 %s2790_s9, 4  ;;  %s2532_s18 = int_to_ptr.vmem [resolvable:$false] %s2531_s18 }
  0x4e   : > { %s2533_s22 = scalar_lea.vmem %s2532_s18, 4096  ;;  %p2534_p1 = scmp.lt.s32.totalorder %s2956_s17, %s2532_s18 }
  0x4f   : > { %p2529_p12 = pnand %p2527_p10, %p2922_p9  ;;  %p2535_p3 = scmp.lt.s32.totalorder %s2533_s22, %s2526_s1 }
  0x51   : > { %p2530_p13 = pneg %p2529_p12  ;;  %p2536_p0 = por %p2535_p3, %p2534_p1 }
  0x53   : > { %p2537_p2 = pnand %p2536_p0, %p2530_p13 }
  0x55   : > { %2540 = shalt.err (!%p2537_p2)
}
  0x56   : > { %s3689_s12 = smov 128   ;;  %s3690_s20 = smov 8  }
  0x57   : > { %2278 = dma.hbm_to_vmem [thread:$0]  (!%p2891_p7), %s2953_s8, 2048, %s2956_s17, %s2960_s30, %s3689_s12, %s3689_s12, %s3690_s20  }
  0x58   : > { %s2988_s19 = sadd.s32 4294967295, %s2785_s29   ;;  %s1961_s13 = sadd.s32 4294967294, %s2785_s29  }
  0x59   : > { %p68_p11 = scmp.ne.s32.totalorder %s2769_s25, %s2765_s24  ;;  %p3701_p4 = scmp.eq.s32.totalorder %s2988_s19, 0 }
  0x5a   : > { %p227_p5 = scmp.eq.s32.totalorder %s2988_s19, 1  ;;  %p233_p6 = scmp.eq.s32.totalorder %s1961_s13, 1 }
  0x5b   : > { %p2997_p8 = por %p3701_p4, %p68_p11  ;;  %p1962_p10 = scmp.ge.s32.totalorder %s2785_s29, 1 }
  0x5c   : > { %p3725_p12 = scmp.ne.s32.totalorder %s2773_s26, %s2769_s25  ;;  %p3009_p1 = por %p233_p6, %p68_p11 }
  0x5d   : > { %s3724_s1 = scalar_select %p2997_p8, 1, 0 }
  0x5e   : > { %p3005_p13 = por %p227_p5, %p3725_p12  ;;  %p268_p3 = scmp.lt.s32.totalorder %s2785_s29, 3 }
  0x5f   : > { %s3728_s17 = scalar_select %p3009_p1, 1, 0 }
  0x60   : > { %s3726_s8 = scalar_select %p3005_p13, 1, 0 }
  0x61   : > { %3729 = sst [smem:[#allocation29_spill]] %s3728_s17  ;;  %p3014_p0 = pnand %p1962_p10, %p268_p3 }
  0x62   : > { %3727 = sst [smem:[#allocation28_spill]] %s3726_s8  ;;  %s2793_s18 = smov [#allocation11]  }
  0x63   : > { %s3730_s9 = scalar_select %p3014_p0, 1, 0 }
  0x64   : > { %s280_s22 = sshll.u32 %s2793_s18, 4  ;;  %s1965_s13 = sshll.u32 %s2889_s10, 6  ;;  %s3018_s22 = int_to_ptr.vmem [resolvable:$true] %s280_s22 }
  0x65   : > { %p2262_p2 = pneg %p3014_p0  ;;  %s2062_s16 = sshll.u32 %s2781_s28, 10 }
  0x66   : > { %s298_s12 = scalar_lea.vmem [#allocation2], %s1965_s13  ;;  %s3033_s17 = scalar_lea.hbm %s3674_s0, %s2062_s16 }
  0x67   : > { %s308_s20 = sshll.u32 %s298_s12, 4  ;;  %p3026_p11 = pnand %p2262_p2, %p3701_p4  ;;  %s3035_s20 = int_to_ptr.vmem [resolvable:$true] %s308_s20 }
  0x68   : > { %s3041_s6 = scalar_lea.hbm %s3676_s2, %s2903_s15  ;;  %s2541_s7 = scalar_lea.hbm %s3679_s5, 1024 }
  0x69   : > { %p2542_p5 = scmp.ne.s32.totalorder %s3679_s5, %s2541_s7  ;;  %p2543_p6 = pneg %p3026_p11 }
  0x6a   : > { %p2548_p3 = scmp.lt.u32.totalorder %s2541_s7, %s3679_s5 }
  0x6b   : > { %p2544_p10 = pnand %p2543_p6, %p2542_p5 }
  0x6d   : > { %p2545_p12 = pneg %p2544_p10 }
  0x6f   : > { %p2550_p2 = pnand %p2548_p3, %p2545_p12 }
  0x71   : > { %2553 = shalt.err (!%p2550_p2)
}
  0x72   : > { %s2554_s24 = scalar_lea.vmem %s3018_s22, 1024  ;;  %p2562_p8 = scmp.lt.s32.totalorder %s3018_s22, %s3018_s22 }
  0x73   : > { %p2555_p4 = scmp.ne.s32.totalorder %s3018_s22, %s2554_s24  ;;  %p2563_p0 = scmp.lt.s32.totalorder %s2554_s24, %s2554_s24 }
  0x75   : > { %p2557_p1 = pnand %p2555_p4, %p2543_p6  ;;  %p2564_p7 = por %p2563_p0, %p2562_p8 }
  0x77   : > { %p2558_p13 = pneg %p2557_p1 }
  0x79   : > { %p2565_p9 = pnand %p2564_p7, %p2558_p13 }
  0x7b   : > { %2568 = shalt.err (!%p2565_p9)
}
  0x7c   : > { %s3732_s27 = smov 8   ;;  %s3733_s15 = smov 128  }
  0x7d   : > { %2265 = dma.hbm_to_vmem [thread:$0]  (!%p3026_p11), %s3679_s5, 1024, %s3018_s22, [#allocation12], %s3733_s15, %s3733_s15, %s3732_s27  }
  0x7e   : > { %s295_s8 = scalar_lea.sflag [#allocation3], %s2889_s10  ;;  %s2569_s18 = scalar_lea.hbm %s3033_s17, 1024 }
  0x7f   : > { %p2570_p7 = scmp.ne.s32.totalorder %s3033_s17, %s2569_s18  ;;  %p3734_p9 = scmp.ne.s32.totalorder %s3721_s23, 0 }
  0x80   : > { %s2574_s12 = scalar_lea.hbm %s3674_s0, 2048  ;;  %p2575_p13 = scmp.lt.u32.totalorder %s3033_s17, %s3674_s0 }
  0x81   : > { %p2572_p4 = pnand %p2570_p7, %p3734_p9  ;;  %p2576_p1 = scmp.lt.u32.totalorder %s2574_s12, %s2569_s18 }
  0x82   : > { %p2578_p5 = scmp.lt.u32.totalorder %s2569_s18, %s3033_s17 }
  0x83   : > { %p2573_p8 = pneg %p2572_p4  ;;  %p2577_p0 = por %p2576_p1, %p2575_p13 }
  0x85   : > { %p2579_p6 = por %p2578_p5, %p2577_p0 }
  0x87   : > { %p2580_p10 = pnand %p2579_p6, %p2573_p8 }
  0x89   : > { %2583 = shalt.err (!%p2580_p10)
}
  0x8a   : > { %s2584_s22 = scalar_lea.vmem %s3035_s20, 1024  ;;  %s2794_s24 = smov [#allocation2]  }
  0x8b   : > { %p2585_p11 = scmp.ne.s32.totalorder %s3035_s20, %s2584_s22  ;;  %s2589_s27 = sshll.u32 %s2794_s24, 4  ;;  %s2590_s27 = int_to_ptr.vmem [resolvable:$false] %s2589_s27 }
  0x8c   : > { %s2591_s15 = scalar_lea.vmem %s2590_s27, 2048  ;;  %p2592_p2 = scmp.lt.s32.totalorder %s3035_s20, %s2590_s27 }
  0x8d   : > { %p2587_p12 = pnand %p2585_p11, %p3734_p9  ;;  %p2593_p7 = scmp.lt.s32.totalorder %s2591_s15, %s2584_s22 }
  0x8f   : > { %p2588_p3 = pneg %p2587_p12  ;;  %p2594_p4 = por %p2593_p7, %p2592_p2 }
  0x91   : > { %p2595_p13 = pnand %p2594_p4, %p2588_p3 }
  0x93   : > { %2598 = shalt.err (!%p2595_p13)
}
  0x94   : > { %p3735_p8 = scmp.ne.s32.totalorder %s3718_s11, 0  ;;  %s3736_s7 = smov 4  }
  0x95   : > { %s3737_s16 = smov 64   ;;  %s346_s18 = scalar_lea.vmem [#allocation7], %s2900_s14 }
  0x96   : > { %2269 = dma.hbm_to_vmem [thread:$0]  (!%p3735_p8), %s3033_s17, 1024, %s3035_s20, %s295_s8, %s3737_s16, %s3737_s16, %s3736_s7  }
  0x97   : > { %s356_s3 = sshll.u32 %s346_s18, 4  ;;  %s1977_s13 = sshll.u32 %s2889_s10, 1  ;;  %s3096_s3 = int_to_ptr.vmem [resolvable:$true] %s356_s3 }
  0x98   : > { %s2599_s12 = scalar_lea.hbm %s3041_s6, 2048  ;;  %s2604_s22 = scalar_lea.hbm %s3676_s2, 4096 }
  0x99   : > { %p2600_p1 = scmp.ne.s32.totalorder %s3041_s6, %s2599_s12  ;;  %p2605_p6 = scmp.lt.u32.totalorder %s3041_s6, %s3676_s2 }
  0x9a   : > { %p2606_p10 = scmp.lt.u32.totalorder %s2604_s22, %s2599_s12  ;;  %p2608_p12 = scmp.lt.u32.totalorder %s2599_s12, %s3041_s6 }
  0x9b   : > { %p2602_p0 = pnand %p2600_p1, %p3734_p9 }
  0x9c   : > { %p2607_p11 = por %p2606_p10, %p2605_p6 }
  0x9d   : > { %p2603_p5 = pneg %p2602_p0 }
  0x9e   : > { %p2609_p3 = por %p2608_p12, %p2607_p11 }
  0xa0   : > { %p2610_p2 = pnand %p2609_p3, %p2603_p5 }
  0xa2   : > { %2613 = shalt.err (!%p2610_p2)
}
  0xa3   : > { %s2614_s14 = scalar_lea.vmem %s3096_s3, 2048  ;;  %s2795_s20 = smov [#allocation7]  }
  0xa4   : > { %p2615_p7 = scmp.ne.s32.totalorder %s3096_s3, %s2614_s14  ;;  %s2619_s17 = sshll.u32 %s2795_s20, 4  ;;  %s2620_s17 = int_to_ptr.vmem [resolvable:$false] %s2619_s17 }
  0xa5   : > { %s2621_s8 = scalar_lea.vmem %s2620_s17, 4096  ;;  %p2622_p1 = scmp.lt.s32.totalorder %s3096_s3, %s2620_s17 }
  0xa6   : > { %p2617_p4 = pnand %p2615_p7, %p3734_p9  ;;  %p2623_p0 = scmp.lt.s32.totalorder %s2621_s8, %s2614_s14 }
  0xa8   : > { %p2618_p13 = pneg %p2617_p4  ;;  %p2624_p6 = por %p2623_p0, %p2622_p1 }
  0xaa   : > { %p2625_p10 = pnand %p2624_p6, %p2618_p13 }
  0xac   : > { %2628 = shalt.err (!%p2625_p10)
}
  0xad   : > { %2275 = dma.hbm_to_vmem [thread:$0]  (!%p3735_p8), %s3041_s6, 2048, %s3096_s3, %s2916_s21, %s3737_s16, %s3737_s16, %s3736_s7  }
  0xae   : > { %s2066_s15 = sshll.u32 %s2781_s28, 5  ;;  %s394_s18 = scalar_lea.vmem [#allocation10], %s1977_s13 }
  0xaf   : > { %s403_s12 = sshll.u32 %s394_s18, 4  ;;  %s3129_s22 = scalar_lea.hbm %s3678_s4, %s2066_s15  ;;  %s3131_s12 = int_to_ptr.vmem [resolvable:$true] %s403_s12 }
  0xb0   : > { %s2629_s24 = scalar_lea.hbm %s3129_s22, 32  ;;  %s2634_s21 = scalar_lea.hbm %s3678_s4, 64 }
  0xb1   : > { %p2630_p5 = scmp.ne.s32.totalorder %s3129_s22, %s2629_s24  ;;  %p2635_p3 = scmp.lt.u32.totalorder %s3129_s22, %s3678_s4 }
  0xb2   : > { %p2636_p2 = scmp.lt.u32.totalorder %s2634_s21, %s2629_s24  ;;  %p2638_p4 = scmp.lt.u32.totalorder %s2629_s24, %s3129_s22 }
  0xb3   : > { %p2632_p11 = pnand %p2630_p5, %p3734_p9 }
  0xb4   : > { %p2637_p7 = por %p2636_p2, %p2635_p3 }
  0xb5   : > { %p2633_p12 = pneg %p2632_p11 }
  0xb6   : > { %p2639_p13 = por %p2638_p4, %p2637_p7 }
  0xb8   : > { %p2640_p1 = pnand %p2639_p13, %p2633_p12 }
  0xba   : > { %2643 = shalt.err (!%p2640_p1)
}
  0xbb   : > { %s2644_s3 = scalar_lea.vmem %s3131_s12, 32  ;;  %s2796_s13 = smov [#allocation10]  }
  0xbc   : > { %p2645_p0 = scmp.ne.s32.totalorder %s3131_s12, %s2644_s3  ;;  %s2649_s27 = sshll.u32 %s2796_s13, 4  ;;  %s2650_s27 = int_to_ptr.vmem [resolvable:$false] %s2649_s27 }
  0xbd   : > { %s2651_s14 = scalar_lea.vmem %s2650_s27, 64  ;;  %p2652_p5 = scmp.lt.s32.totalorder %s3131_s12, %s2650_s27 }
  0xbe   : > { %p2647_p6 = pnand %p2645_p0, %p3734_p9  ;;  %p2653_p11 = scmp.lt.s32.totalorder %s2651_s14, %s2644_s3 }
  0xc0   : > { %p2648_p10 = pneg %p2647_p6  ;;  %p2654_p3 = por %p2653_p11, %p2652_p5 }
  0xc2   : > { %p2655_p2 = pnand %p2654_p3, %p2648_p10 }
  0xc4   : > { %2658 = shalt.err (!%p2655_p2)
}
  0xc5   : > { %s2797_s20 = smov 16   ;;  %s2798_s17 = smov 1  }
  0xc6   : > { %2281 = dma.hbm_to_vmem [thread:$0]  (!%p3735_p8), %s3129_s22, 32, %s3131_s12, %s2960_s30, %s2797_s20, %s2797_s20, %s2798_s17  }
  0xc7   : > { %p3738_p9 = scmp.ne.s32.totalorder %s3730_s9, 0 }
  0xc8   : > { %s3158_s23 = sand.u32 (!%p3738_p9), 1, %s2769_s25   ;;  %p3739_p12 = scmp.ne.s32.totalorder (!%p3738_p9), %s3724_s1, 0 }
  0xc9   : > { %415 = sbr.rel (%p3738_p9) target bundleno = 925 (0x39d), region = 44  ;;  %s1981_s8 = sshll.u32 (!%p3738_p9), %s3158_s23, 6 }
  0xca   : > { %s418_s15 = scalar_lea.sflag (!%p3738_p9), [#allocation3], %s3158_s23  ;;  %s3164_s18 = scalar_lea.vmem (!%p3738_p9), [#allocation2], %s1981_s8 }
  0xd0   : > { %2740 = dma.done.wait (%p3739_p12), %s418_s15, 1024  }
  0xd1   : > { %2742 = vsyncadd (%p3739_p12), %s418_s15, 4294966272  ;;  %s426_s30 = sand.u32 1, %s2988_s19   ;;  %s1982_s11 = sshll.u32 %s3158_s23, 7 }
  0xd2   : > { %s427_s9 = scalar_lea.sflag [#allocation6], %s426_s30  ;;  %s3172_s12 = scalar_lea.vmem [#allocation5], %s1982_s11 }
  0xd3   : > { %2744 = dma.done.wait (%p3739_p12), %s427_s9, 4096  }
  0xd4   : > { %2746 = vsyncadd (%p3739_p12), %s427_s9, 4294963200  ;;  %s3178_s26 = scalar_lea.vmem [#allocation7], %s1982_s11  ;;  %s445_s29 = scalar_lea.sflag [#allocation9], %s426_s30 }
  0xd5   : > { %s3180_s22 = scalar_lea.vmem [#allocation8], %s1982_s11 }
  0xd6   : > { %2748 = dma.done.wait (%p3739_p12), %s445_s29, 2080  }
  0xd7   : > { %2750 = vsyncadd (%p3739_p12), %s445_s29, 4294965216  ;;  %s1985_s24 = sshll.u32 %s3158_s23, 1  ;;  %p3740_p8 = scmp.eq.s32.totalorder %s2988_s19, 0 }
  0xd8   : > { %s3189_s6 = scalar_lea.vmem [#allocation10], %s1985_s24 }
  0xd9   : > { %2752 = dma.done.wait (%p3740_p8), [#allocation12], 1024   ;;  %p3741_p7 = pmov %p3740_p8 }
  0xda   : > { %v2799_v0 = vmov 0   ;;  %vm699_vm0 = vcmask 261120   ;;  %v2353_v1 = vld [vmem:[%s3172_s12] sm:$0xff]   ;;  %v2355_v4 = vld [vmem:[%s3172_s12 + $0x8] sm:$0xff]   ;;  %v2357_v8 = vld [vmem:[%s3172_s12 + $0x10] sm:$0xff]   ;;  %s3742_s19 = sld [smem:[#allocation24_spill]] }
  0xdb   : > { %2754 = vsyncadd (%p3741_p7), [#allocation12], 4294966272  ;;  %2352 = vset.pattern.permute.xlu1 %v2799_v0  ;;  %2351 = vset.pattern.permute.xlu0 %v2799_v0  ;;  %v2354_v2 = vld [vmem:[%s3172_s12 + $0x40] sm:$0xff]   ;;  %v713_v3 = vsel %vm699_vm0, %v2353_v1, 0  ;;  %v2356_v6 = vld [vmem:[%s3172_s12 + $0x48] sm:$0xff]   ;;  %v716_v7 = vsel %vm699_vm0, %v2355_v4, 0 }
  0xdc   : > { %2228 = vmatprep.subr.msk.bf16.mxu0 %vm699_vm0, %v2353_v1  ;;  %2236 = vmatprep.subr.msk.bf16.mxu1 %vm699_vm0, %v2354_v2  ;;  %v874_v5 = vsel %vm699_vm0, %v2354_v2, 0  ;;  %v877_v9 = vsel %vm699_vm0, %v2356_v6, 0  ;;  %v2358_v10 = vld [vmem:[%s3172_s12 + $0x50] sm:$0xff]   ;;  %v719_v11 = vsel %vm699_vm0, %v2357_v8, 0  ;;  %v2359_v12 = vld [vmem:[%s3172_s12 + $0x18] sm:$0xff]   ;;  %v629_v16 = vld [vmem:[%s3180_s22 + $0x40] sm:$0xff] }
  0xdd   : > { %2133 = vmatpush3.bf16.xpose.msra.mxu0 %v713_v3  ;;  %2157 = vmatpush3.bf16.xpose.msra.mxu1 %v874_v5  ;;  %v880_v13 = vsel %vm699_vm0, %v2358_v10, 0  ;;  %v525_v14 = vld [vmem:[%s3164_s18] sm:$0xf]  ;;  %v526_v15 = vld [vmem:[%s3164_s18 + $0x4] sm:$0xf]  ;;  %v2360_v17 = vld [vmem:[%s3172_s12 + $0x58] sm:$0xff]  }
  0xde   : > { %2229 = vmatprep.subr.msk.bf16.mxu0 %vm699_vm0, %v2355_v4  ;;  %2237 = vmatprep.subr.msk.bf16.mxu1 %vm699_vm0, %v2356_v6  ;;  %v541_v18 = vmul.bf16 1043676725, %v525_v14  ;;  %v542_v19 = vmul.bf16 1043676725, %v526_v15  ;;  %v621_v20 = vld [vmem:[%s3180_s22] sm:$0xff]  ;;  %v722_v27 = vsel %vm699_vm0, %v2359_v12, 0 }
  0xdf   : > { %987 = vperm.xlu1 %2352, %v629_v16   ;;  %v533_v21 = vld [vmem:[%s3164_s18 + $0x20] sm:$0xf]  ;;  %v534_v22 = vld [vmem:[%s3164_s18 + $0x24] sm:$0xf]  ;;  %963 = vperm.xlu0 %2351, %v621_v20   ;;  %v883_v29 = vsel %vm699_vm0, %v2360_v17, 0  ;;  %v2363_v31 = vld [vmem:[%s3172_s12 + $0x28] sm:$0xff]  }
  0xe0   : > { %v1989_v23 = vcombine.low %v541_v18, %v542_v19  ;;  %v549_v24 = vmul.bf16 1043676725, %v533_v21  ;;  %v550_v25 = vmul.bf16 1043676725, %v534_v22  ;;  %v2361_v28 = vld [vmem:[%s3172_s12 + $0x20] sm:$0xff]   ;;  %v630_v32 = vld [vmem:[%s3180_s22 + $0x48] sm:$0xff] }
  0xe1   : > { %v2362_v30 = vld [vmem:[%s3172_s12 + $0x60] sm:$0xff]   ;;  %v622_v33 = vld [vmem:[%s3180_s22 + $0x8] sm:$0xff]  ;;  %v624_v35 = vld [vmem:[%s3180_s22 + $0x18] sm:$0xff]  ;;  %v725_v36 = vsel %vm699_vm0, %v2361_v28, 0  ;;  %v728_v38 = vsel %vm699_vm0, %v2363_v31, 0  ;;  %s2059_s1 = sshll.u32 %s3742_s19, 5 }
  0xe2   : > { %2148 = vmatprep.mubr.msk.bf16.mxu0 %vm699_vm0, %v1989_v23  ;;  %v2005_v26 = vcombine.low %v549_v24, %v550_v25  ;;  %v2364_v34 = vld [vmem:[%s3172_s12 + $0x68] sm:$0xff]   ;;  %v886_v37 = vsel %vm699_vm0, %v2362_v30, 0  ;;  %v623_v39 = vld [vmem:[%s3180_s22 + $0x10] sm:$0xff]  ;;  %v632_v41 = vld [vmem:[%s3180_s22 + $0x58] sm:$0xff]  ;;  %s516_s10 = scalar_lea.vmem [#allocation14], %s1985_s24  ;;  %s3743_s21 = sld [smem:[#allocation28_spill]] }
  0xe3   : > { %990 = vperm.xlu1 %2352, %v630_v32   ;;  %966 = vperm.xlu0 %2351, %v622_v33   ;;  %v889_v40 = vsel %vm699_vm0, %v2364_v34, 0  ;;  %v631_v42 = vld [vmem:[%s3180_s22 + $0x50] sm:$0xff]  ;;  %v626_v43 = vld [vmem:[%s3180_s22 + $0x28] sm:$0xff]  ;;  %v625_v44 = vld [vmem:[%s3180_s22 + $0x20] sm:$0xff]  ;;  %s1735_s7 = sshll.u32 %s516_s10, 4  ;;  %s3744_s13 = sld [smem:[#allocation33_spill]]  ;;  %s3542_s7 = int_to_ptr.vmem [resolvable:$true] %s1735_s7 }
  0xe4   : > { %2172 = vmatprep.mubr.msk.bf16.mxu1 %vm699_vm0, %v2005_v26  ;;  %v2365_v45 = vld [vmem:[%s3172_s12 + $0x30] sm:$0xff]   ;;  %v634_v47 = vld [vmem:[%s3180_s22 + $0x68] sm:$0xff]  ;;  %v633_v48 = vld [vmem:[%s3180_s22 + $0x60] sm:$0xff]  ;;  %s1702_s14 = scalar_lea.sflag [#allocation15], %s3158_s23  ;;  %s2659_s20 = scalar_lea.vmem %s3542_s7, 32 }
  0xe5   : > { %2135 = vmatpush3.bf16.xpose.msra.mxu0 %v716_v7  ;;  %2159 = vmatpush3.bf16.xpose.msra.mxu1 %v877_v9  ;;  %v2366_v46 = vld [vmem:[%s3172_s12 + $0x70] sm:$0xff]   ;;  %v628_v49 = vld [vmem:[%s3180_s22 + $0x38] sm:$0xff]  ;;  %v731_v51 = vsel %vm699_vm0, %v2365_v45, 0  ;;  %v527_v58 = vld [vmem:[%s3164_s18 + $0x8] sm:$0xf]  ;;  %p2660_p4 = scmp.ne.s32.totalorder %s3542_s7, %s2659_s20  ;;  %s2800_s17 = smov [#allocation14]  }
  0xe6   : > { %2230 = vmatprep.subr.msk.bf16.mxu0 %vm699_vm0, %v2357_v8  ;;  %2238 = vmatprep.subr.msk.bf16.mxu1 %vm699_vm0, %v2358_v10  ;;  %v627_v50 = vld [vmem:[%s3180_s22 + $0x30] sm:$0xff]  ;;  %v2367_v52 = vld [vmem:[%s3172_s12 + $0x38] sm:$0xff]   ;;  %v892_v53 = vsel %vm699_vm0, %v2366_v46, 0  ;;  %v528_v59 = vld [vmem:[%s3164_s18 + $0xc] sm:$0xf]  ;;  %s2663_s15 = sshll.u32 %s2800_s17, 4  ;;  %s2664_s15 = int_to_ptr.vmem [resolvable:$false] %s2663_s15 }
  0xe7   : > { %972 = vperm.xlu1 %2352, %v624_v35   ;;  %969 = vperm.xlu0 %2351, %v623_v39   ;;  %v2368_v54 = vld [vmem:[%s3172_s12 + $0x78] sm:$0xff]   ;;  %v635_v56 = vld [vmem:[%s3180_s22 + $0x70] sm:$0xff]  ;;  %v734_v57 = vsel %vm699_vm0, %v2367_v52, 0  ;;  %v535_v60 = vld [vmem:[%s3164_s18 + $0x28] sm:$0xf]  ;;  %p2666_p6 = scmp.lt.s32.totalorder %s3542_s7, %s2664_s15 }
  0xe8   : > { %v636_v55 = vld [vmem:[%s3180_s22 + $0x78] sm:$0xff]  ;;  %v536_v61 = vld [vmem:[%s3164_s18 + $0x2c] sm:$0xf]  ;;  %v529_v62 = vld [vmem:[%s3164_s18 + $0x10] sm:$0xf]  ;;  %v895_v0 = vsel %vm699_vm0, %v2368_v54, 0 }
  0xe9   : > { %v530_v63 = vld [vmem:[%s3164_s18 + $0x14] sm:$0xf]  ;;  %v537_v1 = vld [vmem:[%s3164_s18 + $0x30] sm:$0xf]  ;;  %v543_v3 = vmul.bf16 1043676725, %v527_v58  ;;  %s3540_s27 = scalar_lea.hbm %s3744_s13, %s2059_s1 }
  0xea   : > { %v538_v2 = vld [vmem:[%s3164_s18 + $0x34] sm:$0xf]  ;;  %v544_v4 = vmul.bf16 1043676725, %v528_v59  ;;  %v551_v5 = vmul.bf16 1043676725, %v535_v60 }
  0xeb   : > { %996 = vperm.xlu1 %2352, %v632_v41   ;;  %993 = vperm.xlu0 %2351, %v631_v42   ;;  %v552_v6 = vmul.bf16 1043676725, %v536_v61  ;;  %v545_v7 = vmul.bf16 1043676725, %v529_v62  ;;  %v546_v8 = vmul.bf16 1043676725, %v530_v63 }
  0xec   : > { %v553_v9 = vmul.bf16 1043676725, %v537_v1  ;;  %v554_v10 = vmul.bf16 1043676725, %v538_v2  ;;  %v531_v14 = vld [vmem:[%s3164_s18 + $0x18] sm:$0xf] }
  0xed   : > { %2137 = vmatpush3.bf16.xpose.msra.mxu0 %v719_v11  ;;  %2161 = vmatpush3.bf16.xpose.msra.mxu1 %v880_v13  ;;  %v1990_v11 = vcombine.low %v543_v3, %v544_v4  ;;  %v1991_v13 = vcombine.low %v545_v7, %v546_v8  ;;  %v532_v15 = vld [vmem:[%s3164_s18 + $0x1c] sm:$0xf]  ;;  %v547_v19 = vmul.bf16 1043676725, %v531_v14  ;;  %v2369_v25 = vld [vmem:[%s3178_s26] sm:$0xff]   ;;  %v2370_v26 = vld [vmem:[%s3178_s26 + $0x8] sm:$0xff]  }
  0xee   : > { %2231 = vmatprep.subr.msk.bf16.mxu0 %vm699_vm0, %v2359_v12  ;;  %2239 = vmatprep.subr.msk.bf16.mxu1 %vm699_vm0, %v2360_v17  ;;  %v2006_v12 = vcombine.low %v551_v5, %v552_v6  ;;  %v2007_v16 = vcombine.low %v553_v9, %v554_v10  ;;  %v539_v17 = vld [vmem:[%s3164_s18 + $0x38] sm:$0xf]  ;;  %v540_v18 = vld [vmem:[%s3164_s18 + $0x3c] sm:$0xf]  ;;  %v548_v20 = vmul.bf16 1043676725, %v532_v15 }
  0xef   : > { %978 = vperm.xlu1 %2352, %v626_v43   ;;  %975 = vperm.xlu0 %2351, %v625_v44   ;;  %v555_v21 = vmul.bf16 1043676725, %v539_v17  ;;  %v556_v22 = vmul.bf16 1043676725, %v540_v18  ;;  %v3288_v35 = vld [vmem:[%s3189_s6] ss:$0 sm:$0xff] }
  0xf0   : > { %v1992_v23 = vcombine.low %v547_v19, %v548_v20  ;;  %v1050_v41 = vld [vmem:[#allocation11] sm:$0xff]  ;;  %v1051_v59 = vld [vmem:[#allocation11 + $0x8] sm:$0xff]  ;;  %v1053_v63 = vld [vmem:[#allocation11 + $0x18] sm:$0xff]  ;;  %p3745_p13 = scmp.ne.s32.totalorder %s3743_s21, 0  ;;  %s2665_s18 = scalar_lea.vmem %s2664_s15, 64 }
  0xf1   : > { %v2008_v24 = vcombine.low %v555_v21, %v556_v22  ;;  %v1056_v9 = vld [vmem:[#allocation11 + $0x30] sm:$0xff]  ;;  %p2667_p10 = scmp.lt.s32.totalorder %s2665_s18, %s2659_s20 }
  0xf2   : > { %p2661_p1 = pnand %p2660_p4, %p3745_p13 }
  0xf3   : > { %1002 = vperm.xlu1 %2352, %v634_v47   ;;  %999 = vperm.xlu0 %2351, %v633_v48   ;;  %p2668_p5 = por %p2667_p10, %p2666_p6 }
  0xf4   : > { %p2662_p0 = pneg %p2661_p1 }
  0xf5   : > { %2139 = vmatpush3.bf16.xpose.msra.mxu0 %v722_v27  ;;  %2163 = vmatpush3.bf16.xpose.msra.mxu1 %v883_v29 }
  0xf6   : > { %2232 = vmatprep.subr.msk.bf16.mxu0 %vm699_vm0, %v2361_v28  ;;  %2240 = vmatprep.subr.msk.bf16.mxu1 %vm699_vm0, %v2362_v30  ;;  %p2669_p11 = pnand %p2668_p5, %p2662_p0 }
  0xf7   : > { %984 = vperm.xlu1 %2352, %v628_v49   ;;  %981 = vperm.xlu0 %2351, %v627_v50  }
  0xfb   : > { %1008 = vperm.xlu1 %2352, %v636_v55   ;;  %1005 = vperm.xlu0 %2351, %v635_v56  }
  0xfd   : > { %2141 = vmatpush3.bf16.xpose.msra.mxu0 %v725_v36  ;;  %2165 = vmatpush3.bf16.xpose.msra.mxu1 %v886_v37  ;;  %v3291_v36 = vld [vmem:[%s3189_s6 + $0x1] ss:$0 sm:$0xff] }
  0xfe   : > { %2233 = vmatprep.subr.msk.bf16.mxu0 %vm699_vm0, %v2363_v31  ;;  %2241 = vmatprep.subr.msk.bf16.mxu1 %vm699_vm0, %v2364_v34 }
 0x105   : > { %2143 = vmatpush3.bf16.xpose.msra.mxu0 %v728_v38  ;;  %2167 = vmatpush3.bf16.xpose.msra.mxu1 %v889_v40  ;;  %v1052_v38 = vld [vmem:[#allocation11 + $0x10] sm:$0xff] }
 0x106   : > { %2234 = vmatprep.subr.msk.bf16.mxu0 %vm699_vm0, %v2365_v45  ;;  %2242 = vmatprep.subr.msk.bf16.mxu1 %vm699_vm0, %v2366_v46 }
 0x10d   : > { %2145 = vmatpush3.bf16.xpose.msra.mxu0 %v731_v51  ;;  %2169 = vmatpush3.bf16.xpose.msra.mxu1 %v892_v53 }
 0x10e   : > { %2235 = vmatprep.subr.msk.bf16.mxu0 %vm699_vm0, %v2367_v52  ;;  %2243 = vmatprep.subr.msk.bf16.mxu1 %vm699_vm0, %v2368_v54 }
 0x115   : > { %2147 = vmatpush3.bf16.xpose.msra.mxu0 %v734_v57  ;;  %2171 = vmatpush3.bf16.xpose.msra.mxu1 %v895_v0 }
 0x116   : > { %2180 = vmatprep.subr.bf16.mxu0 %v2369_v25 }
 0x11c   : > { %2149 = vmatmul.mubr.msk.bf16.vlgmr.msra.gmra.mrb[0].mxu0 %vm699_vm0, %v1990_v11  ;;  %2173 = vmatmul.mubr.msk.bf16.vlgmr.msra.gmra.mrb[0].mxu1 %vm699_vm0, %v2006_v12 }
 0x11d   : > { %2152 = vmatprep.mubr.msk.bf16.mxu0 %vm699_vm0, %v1991_v13  ;;  %2176 = vmatprep.mubr.msk.bf16.mxu1 %vm699_vm0, %v2007_v16  ;;  %v1054_v16 = vld [vmem:[#allocation11 + $0x20] sm:$0xff] }
 0x11e   : > { %2181 = vmatpush3.bf16.msra.mxu0 %v2369_v25  ;;  %v1057_v25 = vld [vmem:[#allocation11 + $0x38] sm:$0xff] }
 0x11f   : > { %2182 = vmatprep.subr.bf16.mxu0 %v2370_v26 }
 0x122   : > { %2183 = vmatpush3.bf16.msra.mxu0 %v2370_v26  ;;  %v2372_v26 = vld [vmem:[%s3178_s26 + $0x40] sm:$0xff]  }
 0x123   : > { %2204 = vmatprep.subr.bf16.mxu1 %v2372_v26 }
 0x124   : > { %2153 = vmatmul.mubr.msk.bf16.gmra.mrb[4].mxu0 %vm699_vm0, %v1992_v23  ;;  %2177 = vmatmul.mubr.msk.bf16.gmra.mrb[4].mxu1 %vm699_vm0, %v2008_v24  ;;  %v2371_v23 = vld [vmem:[%s3178_s26 + $0x10] sm:$0xff]  }
 0x125   : > { %2184 = vmatprep.subr.bf16.mxu0 %v2371_v23  ;;  %2205 = vmatpush3.bf16.msra.mxu1 %v2372_v26 }
 0x126   : > { %2185 = vmatpush3.bf16.msra.mxu0 %v2371_v23 }
 0x15e   : > { %v964_v27 = vpop.permute.xlu0 %963  ;;  %v988_v29 = vpop.permute.xlu1 %987 }
 0x15f   : > { %vm1018_vm2 = vcmp.eq.s32.totalorder %v964_v27, %v3288_v35  ;;  %vm1026_vm4 = vcmp.eq.s32.totalorder %v988_v29, %v3291_v36 }
 0x162   : > { %v967_v28 = vpop.permute.xlu0 %966  ;;  %v3285_v31 = vpop.permute.xlu1 %990 }
 0x163   : > { %vm1019_vm5 = vcmp.eq.s32.totalorder %v967_v28, %v3288_v35  ;;  %vm1027_vm10 = vcmp.eq.s32.totalorder %v3285_v31, %v3291_v36 }
 0x166   : > { %v970_v30 = vpop.permute.xlu0 %969  ;;  %v973_v33 = vpop.permute.xlu1 %972 }
 0x167   : > { %vm1020_vm1 = vcmp.eq.s32.totalorder %v970_v30, %v3288_v35  ;;  %vm1021_vm6 = vcmp.eq.s32.totalorder %v973_v33, %v3288_v35  ;;  %v2373_v30 = vld [vmem:[%s3178_s26 + $0x18] sm:$0xff]   ;;  %v2374_v33 = vld [vmem:[%s3178_s26 + $0x48] sm:$0xff]  }
 0x168   : > { %2186 = vmatprep.subr.bf16.mxu0 %v2373_v30  ;;  %2206 = vmatprep.subr.bf16.mxu1 %v2374_v33 }
 0x169   : > { %2187 = vmatpush3.bf16.msra.mxu0 %v2373_v30  ;;  %2207 = vmatpush3.bf16.msra.mxu1 %v2374_v33 }
 0x16a   : > { %v994_v32 = vpop.permute.xlu0 %993  ;;  %v997_v37 = vpop.permute.xlu1 %996 }
 0x16b   : > { %vm1028_vm3 = vcmp.eq.s32.totalorder %v994_v32, %v3291_v36  ;;  %vm1029_vm8 = vcmp.eq.s32.totalorder %v997_v37, %v3291_v36  ;;  %v1055_v32 = vld [vmem:[#allocation11 + $0x28] sm:$0xff]  ;;  %v2375_v37 = vld [vmem:[%s3178_s26 + $0x20] sm:$0xff]  }
 0x16c   : > { %2188 = vmatprep.subr.bf16.mxu0 %v2375_v37 }
 0x16d   : > { %2189 = vmatpush3.bf16.msra.mxu0 %v2375_v37 }
 0x16e   : > { %v976_v34 = vpop.permute.xlu0 %975  ;;  %v979_v55 = vpop.permute.xlu1 %978 }
 0x16f   : > { %vm1022_vm9 = vcmp.eq.s32.totalorder %v976_v34, %v3288_v35  ;;  %vm1023_vm14 = vcmp.eq.s32.totalorder %v979_v55, %v3288_v35 }
 0x172   : > { %v3294_v39 = vpop.permute.xlu0 %999  ;;  %v1003_v10 = vpop.permute.xlu1 %1002 }
 0x173   : > { %vm1030_vm11 = vcmp.eq.s32.totalorder %v3294_v39, %v3291_v36  ;;  %vm1031_vm15 = vcmp.eq.s32.totalorder %v1003_v10, %v3291_v36 }
 0x176   : > { %v982_v60 = vpop.permute.xlu0 %981  ;;  %v985_v18 = vpop.permute.xlu1 %984 }
 0x177   : > { %vm1024_vm7 = vcmp.eq.s32.totalorder %v982_v60, %v3288_v35  ;;  %vm1025_vm12 = vcmp.eq.s32.totalorder %v985_v18, %v3288_v35 }
 0x17a   : > { %v1006_v20 = vpop.permute.xlu0 %1005 }
 0x17b   : > { %vm1032_vm13 = vcmp.eq.s32.totalorder %v1006_v20, %v3291_v36 }
 0x1ef   : > { %v2150_v40 = vpop.f32.mrb[0].mxu0  ;;  %v2174_v43 = vpop.f32.mrb[0].mxu1 }
 0x1f0   : > { %v1036_v42 = vsel %vm1020_vm1, -50000.0, %v2150_v40  ;;  %v770_v44 = vpop.f32.mrb[1].mxu0  ;;  %v931_v46 = vpop.f32.mrb[1].mxu1  ;;  %v1044_v49 = vsel %vm1028_vm3, -50000.0, %v2174_v43  ;;  %v2376_v40 = vld [vmem:[%s3178_s26 + $0x50] sm:$0xff]   ;;  %vm1608_vm1 = vcmask 130112  }
 0x1f1   : > { %v1034_v45 = vsel %vm1018_vm2, -50000.0, %v770_v44  ;;  %v2151_v47 = vpop.f32.mrb[2].mxu0  ;;  %v3298_v48 = vadd.f32 %v1052_v38, %v1036_v42  ;;  %v2175_v50 = vpop.f32.mrb[2].mxu1  ;;  %v1042_v53 = vsel %vm1026_vm4, -50000.0, %v931_v46  ;;  %v3306_v56 = vadd.f32 %v1052_v38, %v1044_v49  ;;  %2208 = vmatprep.subr.bf16.mxu1 %v2376_v40  ;;  %v2377_v42 = vld [vmem:[%s3178_s26 + $0x28] sm:$0xff]   ;;  %v2378_v44 = vld [vmem:[%s3178_s26 + $0x58] sm:$0xff]  }
 0x1f2   : > { %v773_v51 = vpop.f32.mrb[3].mxu0  ;;  %v3301_v52 = vadd.f32 %v1050_v41, %v1034_v45  ;;  %v934_v54 = vpop.f32.mrb[3].mxu1  ;;  %v3309_v58 = vadd.f32 %v1050_v41, %v1042_v53  ;;  %v1037_v61 = vsel %vm1021_vm6, -50000.0, %v2151_v47  ;;  %v1045_v11 = vsel %vm1029_vm8, -50000.0, %v2175_v50  ;;  %2209 = vmatpush3.bf16.msra.mxu1 %v2376_v40  ;;  %2190 = vmatprep.subr.bf16.mxu0 %v2377_v42  ;;  %v2379_v46 = vld [vmem:[%s3178_s26 + $0x30] sm:$0xff]   ;;  %v2381_v47 = vld [vmem:[%s3178_s26 + $0x38] sm:$0xff]  }
 0x1f3   : > { %1078 = vmax.xlane.f32.xlu1 %v3298_v48  ;;  %v1035_v57 = vsel %vm1019_vm5, -50000.0, %v773_v51  ;;  %v3319_v8 = vadd.f32 %v1053_v63, %v1037_v61  ;;  %v3328_v15 = vadd.f32 %v1053_v63, %v1045_v11  ;;  %v1043_v17 = vsel %vm1027_vm10, -50000.0, %v934_v54  ;;  %v1009_v38 = vpop.permute.xlu1 %1008  ;;  %2191 = vmatpush3.bf16.msra.mxu0 %v2377_v42  ;;  %v2382_v49 = vld [vmem:[%s3178_s26 + $0x68] sm:$0xff]   ;;  %v2383_v50 = vld [vmem:[%s3178_s26 + $0x70] sm:$0xff]   ;;  %v2384_v51 = vld [vmem:[%s3178_s26 + $0x78] sm:$0xff]  }
 0x1f4   : > { %1074 = vmax.xlane.f32.xlu0 %v3301_v52  ;;  %v3314_v4 = vadd.f32 %v1051_v59, %v1035_v57  ;;  %v3337_v22 = vadd.f32 %v1051_v59, %v1043_v17  ;;  %vm1033_vm0 = vcmp.eq.s32.totalorder %v1009_v38, %v3291_v36  ;;  %2210 = vmatprep.subr.bf16.mxu1 %v2378_v44  ;;  %v2380_v36 = vld [vmem:[%s3178_s26 + $0x60] sm:$0xff]   ;;  %vm1615_vm2 = vcmask 195712  }
 0x1f5   : > { %2192 = vmatprep.subr.bf16.mxu0 %v2379_v46  ;;  %vm1622_vm3 = vcmask 261312   ;;  %vm1629_vm4 = vcmask 326912   ;;  %vm1636_vm5 = vcmask 392512   ;;  %vm1643_vm6 = vcmask 458112  }
 0x1f6   : > { %2211 = vmatpush3.bf16.msra.mxu1 %v2378_v44  ;;  %vm1691_vm8 = vcmask 1041409  }
 0x1f7   : > { %1094 = vmax.xlane.f32.xlu1 %v3306_v56  ;;  %v2154_v62 = vpop.f32.mrb[4].mxu0  ;;  %v2178_v0 = vpop.f32.mrb[4].mxu1  ;;  %2193 = vmatpush3.bf16.msra.mxu0 %v2379_v46 }
 0x1f8   : > { %1090 = vmax.xlane.f32.xlu0 %v3309_v58  ;;  %v786_v1 = vpop.f32.mrb[5].mxu0  ;;  %v947_v2 = vpop.f32.mrb[5].mxu1  ;;  %v1040_v5 = vsel %vm1024_vm7, -50000.0, %v2154_v62  ;;  %v1048_v28 = vsel %vm1032_vm13, -50000.0, %v2178_v0  ;;  %2212 = vmatprep.subr.bf16.mxu1 %v2380_v36  ;;  %vm1650_vm7 = vcmask 523712  }
 0x1f9   : > { %v2155_v3 = vpop.f32.mrb[6].mxu0  ;;  %v3317_v6 = vpop.f32.mrb[6].mxu1  ;;  %v3324_v13 = vadd.f32 %v1056_v9, %v1040_v5  ;;  %v1038_v14 = vsel %vm1022_vm9, -50000.0, %v786_v1  ;;  %v1046_v21 = vsel %vm1030_vm11, -50000.0, %v947_v2  ;;  %v3353_v34 = vadd.f32 %v1056_v9, %v1048_v28  ;;  %2194 = vmatprep.subr.bf16.mxu0 %v2381_v47 }
 0x1fa   : > { %v789_v7 = vpop.f32.mrb[7].mxu0  ;;  %v950_v12 = vpop.f32.mrb[7].mxu1  ;;  %v3334_v19 = vadd.f32 %v1054_v16, %v1038_v14  ;;  %v1041_v24 = vsel %vm1025_vm12, -50000.0, %v2155_v3  ;;  %v3344_v27 = vadd.f32 %v1054_v16, %v1046_v21  ;;  %v1049_v43 = vsel %vm1033_vm0, -50000.0, %v3317_v6  ;;  %2213 = vmatpush3.bf16.msra.mxu1 %v2380_v36 }
 0x1fb   : > { %1076 = vmax.xlane.f32.xlu1 %v3314_v4  ;;  %v3347_v29 = vadd.f32 %v1057_v25, %v1041_v24  ;;  %v1039_v31 = vsel %vm1023_vm14, -50000.0, %v789_v7  ;;  %v1047_v39 = vsel %vm1031_vm15, -50000.0, %v950_v12  ;;  %v3369_v45 = vadd.f32 %v1057_v25, %v1049_v43  ;;  %2195 = vmatpush3.bf16.msra.mxu0 %v2381_v47 }
 0x1fc   : > { %1080 = vmax.xlane.f32.xlu0 %v3319_v8  ;;  %v3356_v35 = vadd.f32 %v1055_v32, %v1039_v31  ;;  %v3363_v41 = vadd.f32 %v1055_v32, %v1047_v39  ;;  %2214 = vmatprep.subr.bf16.mxu1 %v2382_v49  ;;  %vm1694_vm9 = vcmask 517120  }
 0x1fe   : > { %2215 = vmatpush3.bf16.msra.mxu1 %v2382_v49 }
 0x1ff   : > { %1086 = vmax.xlane.f32.xlu1 %v3324_v13  ;;  %2216 = vmatprep.subr.bf16.mxu1 %v2383_v50 }
 0x200   : > { %1096 = vmax.xlane.f32.xlu0 %v3328_v15 }
 0x202   : > { %2217 = vmatpush3.bf16.msra.mxu1 %v2383_v50 }
 0x203   : > { %1082 = vmax.xlane.f32.xlu1 %v3334_v19  ;;  %2218 = vmatprep.subr.bf16.mxu1 %v2384_v51 }
 0x204   : > { %1092 = vmax.xlane.f32.xlu0 %v3337_v22 }
 0x206   : > { %2219 = vmatpush3.bf16.msra.mxu1 %v2384_v51 }
 0x207   : > { %1098 = vmax.xlane.f32.xlu1 %v3344_v27 }
 0x208   : > { %1088 = vmax.xlane.f32.xlu0 %v3347_v29 }
 0x20b   : > { %1102 = vmax.xlane.f32.xlu1 %v3353_v34 }
 0x20c   : > { %1084 = vmax.xlane.f32.xlu0 %v3356_v35 }
 0x210   : > { %1100 = vmax.xlane.f32.xlu0 %v3363_v41 }
 0x214   : > { %1104 = vmax.xlane.f32.xlu0 %v3369_v45 }
 0x280   : > { %v3378_v53 = vpop.xlane.xlu1 %1078 }
 0x281   : > { %v1108_v54 = vsub.f32 %v3298_v48, %v3378_v53  ;;  %v3382_v55 = vpop.xlane.xlu0 %1074 }
 0x282   : > { %v1106_v57 = vsub.f32 %v3301_v52, %v3382_v55 }
 0x283   : > { %v1126_v59 = vmul.f32 1.442695, %v1108_v54 }
 0x284   : > { %v1122_v60 = vmul.f32 1.442695, %v1106_v57  ;;  %v3386_v61 = vpop.xlane.xlu1 %1094 }
 0x285   : > { %2385 = vpow2.f32 %v1126_v59  ;;  %v1116_v62 = vsub.f32 %v3306_v56, %v3386_v61  ;;  %v3390_v63 = vpop.xlane.xlu0 %1090 }
 0x286   : > { %v1114_v0 = vsub.f32 %v3309_v58, %v3390_v63  ;;  %2387 = vpow2.f32 %v1122_v60 }
 0x287   : > { %v1142_v1 = vmul.f32 1.442695, %v1116_v62 }
 0x288   : > { %v1138_v48 = vmul.f32 1.442695, %v1114_v0  ;;  %v3394_v2 = vpop.xlane.xlu1 %1076 }
 0x289   : > { %2389 = vpow2.f32 %v1142_v1  ;;  %v1107_v52 = vsub.f32 %v3314_v4, %v3394_v2  ;;  %v3398_v3 = vpop.xlane.xlu0 %1080 }
 0x28a   : > { %v1109_v5 = vsub.f32 %v3319_v8, %v3398_v3  ;;  %2391 = vpow2.f32 %v1138_v48 }
 0x28b   : > { %v1124_v56 = vmul.f32 1.442695, %v1107_v52 }
 0x28c   : > { %v1128_v6 = vmul.f32 1.442695, %v1109_v5  ;;  %v3402_v7 = vpop.xlane.xlu1 %1086 }
 0x28d   : > { %2393 = vpow2.f32 %v1124_v56  ;;  %v1112_v58 = vsub.f32 %v3324_v13, %v3402_v7  ;;  %v3406_v9 = vpop.xlane.xlu0 %1096 }
 0x28e   : > { %2395 = vpow2.f32 %v1128_v6  ;;  %v1117_v4 = vsub.f32 %v3328_v15, %v3406_v9 }
 0x28f   : > { %v2386_v10 = vpop.eup %2385  ;;  %v1134_v8 = vmul.f32 1.442695, %v1112_v58 }
 0x290   : > { %v1144_v11 = vmul.f32 1.442695, %v1117_v4  ;;  %1158 = vadd.xlane.f32.xlu1 %v2386_v10  ;;  %v3410_v12 = vpop.xlane.xlu1 %1082  ;;  %v2388_v17 = vpop.eup %2387 }
 0x291   : > { %v1110_v14 = vsub.f32 %v3334_v19, %v3410_v12  ;;  %v3414_v16 = vpop.xlane.xlu0 %1092 }
 0x292   : > { %2397 = vpow2.f32 %v1144_v11  ;;  %v1115_v13 = vsub.f32 %v3337_v22, %v3414_v16 }
 0x293   : > { %v2390_v18 = vpop.eup %2389  ;;  %2399 = vpow2.f32 %v1134_v8  ;;  %v1130_v21 = vmul.f32 1.442695, %v1110_v14 }
 0x294   : > { %v1140_v20 = vmul.f32 1.442695, %v1115_v13  ;;  %1154 = vadd.xlane.f32.xlu1 %v2388_v17  ;;  %v3418_v15 = vpop.xlane.xlu1 %1098  ;;  %1174 = vadd.xlane.f32.xlu0 %v2390_v18  ;;  %v2392_v24 = vpop.eup %2391 }
 0x295   : > { %v3420_v23 = vpop.xlane.xlu0 %1088  ;;  %v1118_v31 = vsub.f32 %v3344_v27, %v3418_v15 }
 0x296   : > { %2401 = vpow2.f32 %v1140_v20  ;;  %v1113_v19 = vsub.f32 %v3347_v29, %v3420_v23 }
 0x297   : > { %v2394_v25 = vpop.eup %2393  ;;  %2403 = vpow2.f32 %v1130_v21  ;;  %v1146_v42 = vmul.f32 1.442695, %v1118_v31 }
 0x298   : > { %v2396_v26 = vpop.eup %2395  ;;  %v1136_v28 = vmul.f32 1.442695, %v1113_v19  ;;  %1170 = vadd.xlane.f32.xlu1 %v2392_v24  ;;  %v3424_v22 = vpop.xlane.xlu1 %1102  ;;  %v1186_v30 = vpack.c.bf16 %v2394_v25, %v2388_v17  ;;  %v1597_v17 = vlaneseq }
 0x299   : > { %v1120_v32 = vsub.f32 %v3353_v34, %v3424_v22  ;;  %v3430_v33 = vpop.xlane.xlu0 %1084  ;;  %v1187_v37 = vpack.c.bf16 %v2396_v26, %v2386_v10 }
 0x29a   : > { %v1111_v29 = vsub.f32 %v3356_v35, %v3430_v33  ;;  %2196 = vmatprep.mubr.bf16.mxu0 %v1186_v30  ;;  %2405 = vpow2.f32 %v1136_v28  ;;  %v3474_v20 = vand.u32 127, %v1597_v17  ;;  %v3483_v30 = vshrl.u32 %v1597_v17, 7 }
 0x29b   : > { %v1150_v38 = vmul.f32 1.442695, %v1120_v32  ;;  %2197 = vmatmul.mubr.bf16.vlgmr.msra.gmra.mrb[8].mxu0 %v1187_v37 }
 0x29c   : > { %v2398_v39 = vpop.eup %2397  ;;  %v1132_v40 = vmul.f32 1.442695, %v1111_v29  ;;  %1160 = vadd.xlane.f32.xlu1 %v2396_v26  ;;  %v1624_v17 = vadd.s32 4294967264, %v3474_v20 }
 0x29d   : > { %2407 = vpow2.f32 %v1150_v38  ;;  %1176 = vadd.xlane.f32.xlu0 %v2398_v39  ;;  %v3434_v27 = vpop.xlane.xlu0 %1100  ;;  %v2400_v43 = vpop.eup %2399  ;;  %v1191_v49 = vpack.c.bf16 %v2398_v39, %v2390_v18  ;;  %v1610_v38 = vadd.s32 4294967280, %v3474_v20 }
 0x29e   : > { %2409 = vpow2.f32 %v1132_v40  ;;  %v1119_v34 = vsub.f32 %v3363_v41, %v3434_v27 }
 0x29f   : > { %2411 = vpow2.f32 %v1146_v42 }
 0x2a0   : > { %v2402_v44 = vpop.eup %2401  ;;  %v1148_v46 = vmul.f32 1.442695, %v1119_v34  ;;  %1166 = vadd.xlane.f32.xlu1 %v2400_v43 }
 0x2a1   : > { %1156 = vadd.xlane.f32.xlu0 %v2394_v25  ;;  %v3438_v35 = vpop.xlane.xlu0 %1104  ;;  %v1190_v36 = vpack.c.bf16 %v2402_v44, %v2392_v24  ;;  %v2404_v50 = vpop.eup %2403  ;;  %v1603_v24 = vadd.s32 4294967288, %v3474_v20 }
 0x2a2   : > { %2413 = vpow2.f32 %v1148_v46  ;;  %v1121_v47 = vsub.f32 %v3369_v45, %v3438_v35  ;;  %v1601_v46 = vsub.s32 %v3474_v20, %v3483_v30 }
 0x2a3   : > { %2220 = vmatprep.mubr.bf16.mxu1 %v1190_v36  ;;  %v1606_v39 = vsub.s32 %v1603_v24, %v3483_v30 }
 0x2a4   : > { %v1152_v51 = vmul.f32 1.442695, %v1121_v47  ;;  %2221 = vmatmul.mubr.bf16.vlgmr.msra.gmra.mrb[8].mxu1 %v1191_v49  ;;  %1162 = vadd.xlane.f32.xlu1 %v2404_v50  ;;  %v2406_v41 = vpop.eup %2405  ;;  %v1617_v49 = vadd.s32 4294967272, %v3474_v20 }
 0x2a5   : > { %1172 = vadd.xlane.f32.xlu0 %v2402_v44  ;;  %v1189_v60 = vpack.c.bf16 %v2406_v41, %v2400_v43 }
 0x2a6   : > { %2415 = vpow2.f32 %v1152_v51 }
 0x2a7   : > { %v2408_v54 = vpop.eup %2407 }
 0x2a8   : > { %v2410_v57 = vpop.eup %2409 }
 0x2a9   : > { %1182 = vadd.xlane.f32.xlu0 %v2408_v54  ;;  %1164 = vadd.xlane.f32.xlu1 %v2410_v57  ;;  %v1188_v59 = vpack.c.bf16 %v2410_v57, %v2404_v50  ;;  %v2412_v62 = vpop.eup %2411 }
 0x2ab   : > { %2200 = vmatprep.mubr.bf16.mxu0 %v1188_v59 }
 0x2ac   : > { %v2414_v0 = vpop.eup %2413  ;;  %2201 = vmatmul.mubr.bf16.gmra.mrb[12].mxu0 %v1189_v60 }
 0x2ad   : > { %1178 = vadd.xlane.f32.xlu0 %v2412_v62  ;;  %1168 = vadd.xlane.f32.xlu1 %v2406_v41  ;;  %v1192_v45 = vpack.c.bf16 %v2414_v0, %v2412_v62 }
 0x2af   : > { %2224 = vmatprep.mubr.bf16.mxu1 %v1192_v45 }
 0x2b0   : > { %v2416_v1 = vpop.eup %2415 }
 0x2b1   : > { %1180 = vadd.xlane.f32.xlu0 %v2414_v0  ;;  %v1193_v48 = vpack.c.bf16 %v2416_v1, %v2408_v54 }
 0x2b3   : > { %2225 = vmatmul.mubr.bf16.gmra.mrb[12].mxu1 %v1193_v48  ;;  %v1620_v48 = vsub.s32 %v1617_v49, %v3483_v30 }
 0x2b5   : > { %1184 = vadd.xlane.f32.xlu0 %v2416_v1 }
 0x31d   : > { %v3442_v52 = vpop.xlane.xlu1 %1158 }
 0x321   : > { %v3444_v5 = vpop.xlane.xlu1 %1154  ;;  %v3448_v6 = vpop.xlane.xlu0 %1174 }
 0x322   : > { %2417 = vlog2.f32 %v3444_v5 }
 0x323   : > { %2419 = vlog2.f32 %v3442_v52 }
 0x325   : > { %v3446_v56 = vpop.xlane.xlu1 %1170 }
 0x329   : > { %v3450_v58 = vpop.xlane.xlu1 %1160 }
 0x32a   : > { %v3452_v4 = vpop.xlane.xlu0 %1176 }
 0x32c   : > { %v2418_v21 = vpop.eup %2417 }
 0x32d   : > { %v3454_v10 = vpop.xlane.xlu1 %1166  ;;  %v2420_v19 = vpop.eup %2419  ;;  %v1453_v31 = vmul.f32 0.6931472, %v2418_v21 }
 0x32e   : > { %v3457_v11 = vpop.xlane.xlu0 %1156  ;;  %v1457_v42 = vmul.f32 0.6931472, %v2420_v19  ;;  %v1631_v19 = vadd.s32 4294967256, %v3474_v20 }
 0x32f   : > { %2421 = vlog2.f32 %v3457_v11  ;;  %v1484_v36 = vadd.f32 %v1453_v31, %v3382_v55 }
 0x330   : > { %2423 = vlog2.f32 %v3446_v56  ;;  %v1486_v59 = vadd.f32 %v1457_v42, %v3378_v53 }
 0x331   : > { %v3461_v8 = vpop.xlane.xlu1 %1162  ;;  %2425 = vlog2.f32 %v3448_v6  ;;  %v1602_v45 = vrot.slane %v1484_v36, %v1601_v46 }
 0x332   : > { %v3464_v14 = vpop.xlane.xlu0 %1172  ;;  %2427 = vlog2.f32 %v3450_v58 }
 0x333   : > { %2429 = vlog2.f32 %v3464_v14 }
 0x334   : > { %2431 = vlog2.f32 %v3452_v4 }
 0x335   : > { %2433 = vlog2.f32 %v3461_v8 }
 0x336   : > { %v3470_v13 = vpop.xlane.xlu1 %1164  ;;  %v3472_v18 = vpop.xlane.xlu0 %1182 }
 0x337   : > { %2435 = vlog2.f32 %v3470_v13 }
 0x338   : > { %2437 = vlog2.f32 %v3454_v10 }
 0x339   : > { %v2422_v28 = vpop.eup %2421 }
 0x33a   : > { %v3479_v25 = vpop.xlane.xlu1 %1168  ;;  %v3481_v26 = vpop.xlane.xlu0 %1178  ;;  %v1455_v37 = vmul.f32 0.6931472, %v2422_v28 }
 0x33b   : > { %v2424_v32 = vpop.eup %2423  ;;  %2439 = vlog2.f32 %v3479_v25 }
 0x33c   : > { %v2426_v29 = vpop.eup %2425  ;;  %2441 = vlog2.f32 %v3472_v18  ;;  %v1485_v34 = vadd.f32 %v1455_v37, %v3394_v2  ;;  %v1469_v47 = vmul.f32 0.6931472, %v2424_v32  ;;  %v1613_v2 = vsub.s32 %v1610_v38, %v3483_v30 }
 0x33d   : > { %v2428_v40 = vpop.eup %2427  ;;  %2443 = vlog2.f32 %v3481_v26  ;;  %v1473_v60 = vmul.f32 0.6931472, %v2426_v29  ;;  %v1638_v38 = vadd.s32 4294967248, %v3474_v20 }
 0x33e   : > { %v3492_v43 = vpop.xlane.xlu0 %1180  ;;  %v2430_v44 = vpop.eup %2429  ;;  %v1607_v54 = vrot.slane %v1485_v34, %v1606_v39  ;;  %v1459_v62 = vmul.f32 0.6931472, %v2428_v40  ;;  %v1492_v1 = vadd.f32 %v1469_v47, %v3390_v63  ;;  %v1614_v37 = vrot.slane %v1486_v59, %v1613_v2 }
 0x33f   : > { %v2432_v50 = vpop.eup %2431  ;;  %v1471_v51 = vmul.f32 0.6931472, %v2430_v44  ;;  %2445 = vlog2.f32 %v3492_v43  ;;  %v1494_v63 = vadd.f32 %v1473_v60, %v3386_v61  ;;  %v1627_v34 = vsub.s32 %v1624_v17, %v3483_v30 }
 0x340   : > { %v2434_v41 = vpop.eup %2433  ;;  %v1475_v21 = vmul.f32 0.6931472, %v2432_v50  ;;  %v1609_v28 = vsel %vm1608_vm1, %v1607_v54, %v1602_v45  ;;  %v1487_v29 = vadd.f32 %v1459_v62, %v3398_v3  ;;  %v1655_v42 = vrot.slane %v1492_v1, %v1601_v46 }
 0x341   : > { %v2436_v57 = vpop.eup %2435  ;;  %v1493_v0 = vadd.f32 %v1471_v51, %v3414_v16  ;;  %v1461_v24 = vmul.f32 0.6931472, %v2434_v41  ;;  %v1645_v44 = vadd.s32 4294967240, %v3474_v20  ;;  %v1634_v61 = vsub.s32 %v1631_v19, %v3483_v30 }
 0x342   : > { %v3502_v55 = vpop.xlane.xlu0 %1184  ;;  %v2438_v53 = vpop.eup %2437  ;;  %v1463_v31 = vmul.f32 0.6931472, %v2436_v57  ;;  %v1495_v47 = vadd.f32 %v1475_v21, %v3406_v9  ;;  %v1664_v54 = vrot.slane %v1494_v63, %v1613_v2  ;;  %v1621_v57 = vrot.slane %v1487_v29, %v1620_v48 }
 0x343   : > { %2447 = vlog2.f32 %v3502_v55  ;;  %v1659_v16 = vrot.slane %v1493_v0, %v1606_v39  ;;  %v1616_v39 = vsel %vm1615_vm2, %v1614_v37, %v1609_v28  ;;  %v1488_v49 = vadd.f32 %v1461_v24, %v3410_v12 }
 0x344   : > { %v1489_v50 = vadd.f32 %v1463_v31, %v3430_v33  ;;  %v1465_v59 = vmul.f32 0.6931472, %v2438_v53  ;;  %v1648_v9 = vsub.s32 %v1645_v44, %v3483_v30  ;;  %v1669_v12 = vrot.slane %v1495_v47, %v1620_v48 }
 0x345   : > { %v2440_v32 = vpop.eup %2439  ;;  %v1660_v3 = vsel %vm1608_vm1, %v1659_v16, %v1655_v42  ;;  %v1623_v0 = vsel %vm1622_vm3, %v1621_v57, %v1616_v39  ;;  %v1628_v45 = vrot.slane %v1488_v49, %v1627_v34  ;;  %v1641_v19 = vsub.s32 %v1638_v38, %v3483_v30 }
 0x346   : > { %v2442_v40 = vpop.eup %2441  ;;  %v1467_v51 = vmul.f32 0.6931472, %v2440_v32  ;;  %v1665_v1 = vsel %vm1615_vm2, %v1664_v54, %v1660_v3  ;;  %v1635_v33 = vrot.slane %v1489_v50, %v1634_v61  ;;  %v1490_v53 = vadd.f32 %v1465_v59, %v3402_v7 }
 0x347   : > { %v2444_v36 = vpop.eup %2443  ;;  %v1481_v20 = vmul.f32 0.6931472, %v2442_v40  ;;  %v1670_v48 = vsel %vm1622_vm3, %v1669_v12, %v1665_v1  ;;  %v1630_v31 = vsel %vm1629_vm4, %v1628_v45, %v1623_v0 }
 0x348   : > { %v1477_v46 = vmul.f32 0.6931472, %v2444_v36  ;;  %v1491_v17 = vadd.f32 %v1467_v51, %v3420_v23  ;;  %v1642_v7 = vrot.slane %v1490_v53, %v1641_v19 }
 0x349   : > { %v2446_v41 = vpop.eup %2445 }
 0x34a   : > { %v1496_v60 = vadd.f32 %v1477_v46, %v3418_v15  ;;  %v1479_v62 = vmul.f32 0.6931472, %v2446_v41  ;;  %v1498_v15 = vadd.f32 %v1481_v20, %v3424_v22  ;;  %v1649_v32 = vrot.slane %v1491_v17, %v1648_v9 }
 0x34c   : > { %v1674_v21 = vrot.slane %v1496_v60, %v1627_v34  ;;  %v1497_v2 = vadd.f32 %v1479_v62, %v3434_v27  ;;  %v1637_v27 = vsel %vm1636_vm5, %v1635_v33, %v1630_v31  ;;  %v1684_v63 = vrot.slane %v1498_v15, %v1641_v19 }
 0x34d   : > { %v2448_v24 = vpop.eup %2447  ;;  %v1644_v29 = vsel %vm1643_vm6, %v1642_v7, %v1637_v27 }
 0x34e   : > { %v1679_v28 = vrot.slane %v1497_v2, %v1634_v61  ;;  %v1483_v16 = vmul.f32 0.6931472, %v2448_v24  ;;  %v1675_v23 = vsel %vm1629_vm4, %v1674_v21, %v1670_v48  ;;  %v1651_v40 = vsel %vm1650_vm7, %v1649_v32, %v1644_v29 }
 0x350   : > { %v1680_v37 = vsel %vm1636_vm5, %v1679_v28, %v1675_v23  ;;  %v1499_v30 = vadd.f32 %v1483_v16, %v3438_v35 }
 0x351   : > { %v1685_v38 = vsel %vm1643_vm6, %v1684_v63, %v1680_v37 }
 0x352   : > { %v1689_v22 = vrot.slane %v1499_v30, %v1648_v9 }
 0x354   : > { %v1690_v42 = vsel %vm1650_vm7, %v1689_v22, %v1685_v38 }
 0x355   : > { %v1692_v35 = vsel %vm1691_vm8, %v1690_v42, %v1651_v40 }
 0x356   : > { %1695 = vst.msk [vmem:[%s516_s10] sm:$0x3] %vm1694_vm9, %v1692_v35 }
 0x357   : > { %2672 = shalt.err (!%p2669_p11)
}
 0x358   : > { %s2673_s30 = scalar_lea.hbm %s3540_s27, 32  ;;  %s2677_s12 = scalar_lea.hbm %s3744_s13, 64 }
 0x359   : > { %p2674_p3 = scmp.ne.s32.totalorder %s3540_s27, %s2673_s30  ;;  %p2678_p12 = scmp.lt.u32.totalorder %s3540_s27, %s3744_s13 }
 0x35a   : > { %p2679_p8 = scmp.lt.u32.totalorder %s2677_s12, %s2673_s30  ;;  %p2681_p4 = scmp.lt.u32.totalorder %s2673_s30, %s3540_s27 }
 0x35b   : > { %p2675_p2 = pnand %p2674_p3, %p3745_p13 }
 0x35c   : > { %p2680_p7 = por %p2679_p8, %p2678_p12 }
 0x35d   : > { %p2676_p9 = pneg %p2675_p2 }
 0x35e   : > { %p2682_p1 = por %p2681_p4, %p2680_p7 }
 0x360   : > { %p2683_p0 = pnand %p2682_p1, %p2676_p9 }
 0x362   : > { %2686 = shalt.err (!%p2683_p0)
}
 0x363   : > { %2259 = dma.vmem_to_hbm [thread:$0]  (%p3745_p13), %s3542_s7, 32, %s3540_s27, %s1702_s14   ;;  %2449 = vrcp.f32 %v3442_v52  ;;  %vm1564_vm10 = vcmask 257024  }
 0x364   : > { %2451 = vrcp.f32 %v3444_v5  ;;  %s3576_s22 = scalar_lea.vmem [#allocation13], %s1981_s8  ;;  %s2083_s8 = sshll.u32 %s3742_s19, 10 }
 0x365   : > { %2453 = vrcp.f32 %v3450_v58  ;;  %s1718_s24 = sshll.u32 %s3576_s22, 4  ;;  %s3746_s10 = sld [smem:[#allocation32_spill]]  ;;  %s3619_s24 = int_to_ptr.vmem [resolvable:$true] %s1718_s24 }
 0x366   : > { %2455 = vrcp.f32 %v3457_v11  ;;  %s1697_s19 = scalar_lea.sflag [#allocation4], %s3158_s23  ;;  %s2687_s16 = scalar_lea.vmem %s3619_s24, 1024 }
 0x367   : > { %2457 = vrcp.f32 %v3448_v6  ;;  %p2688_p6 = scmp.ne.s32.totalorder %s3619_s24, %s2687_s16  ;;  %s2801_s3 = smov [#allocation13]  }
 0x368   : > { %2459 = vrcp.f32 %v3446_v56  ;;  %s2691_s27 = sshll.u32 %s2801_s3, 4  ;;  %s2692_s27 = int_to_ptr.vmem [resolvable:$false] %s2691_s27 }
 0x369   : > { %2461 = vrcp.f32 %v3452_v4  ;;  %p2689_p10 = pnand %p2688_p6, %p3745_p13  ;;  %s2693_s14 = scalar_lea.vmem %s2692_s27, 2048 }
 0x36a   : > { %2463 = vrcp.f32 %v3464_v14  ;;  %p2694_p11 = scmp.lt.s32.totalorder %s3619_s24, %s2692_s27  ;;  %p2695_p3 = scmp.lt.s32.totalorder %s2693_s14, %s2687_s16 }
 0x36b   : > { %2465 = vrcp.f32 %v3454_v10  ;;  %s3617_s7 = scalar_lea.hbm %s3746_s10, %s2083_s8  ;;  %p2690_p5 = pneg %p2689_p10 }
 0x36c   : > { %2467 = vrcp.f32 %v3461_v8  ;;  %p2696_p2 = por %p2695_p3, %p2694_p11 }
 0x36d   : > { %v2450_v34 = vpop.eup %2449  ;;  %2469 = vrcp.f32 %v3479_v25 }
 0x36e   : > { %v2198_v44 = vpop.f32.mrb[8].mxu0  ;;  %v2452_v36 = vpop.eup %2451  ;;  %2471 = vrcp.f32 %v3470_v13  ;;  %p2697_p9 = pnand %p2696_p2, %p2690_p5 }
 0x36f   : > { %v1438_v47 = vmul.f32 %v2450_v34, %v2198_v44  ;;  %v1276_v39 = vpop.f32.mrb[9].mxu0  ;;  %v2454_v49 = vpop.eup %2453  ;;  %2473 = vrcp.f32 %v3472_v18 }
 0x370   : > { %v1436_v52 = vmul.f32 %v2452_v36, %v1276_v39  ;;  %v2199_v5 = vpop.f32.mrb[10].mxu0  ;;  %v2456_v58 = vpop.eup %2455  ;;  %2475 = vrcp.f32 %v3481_v26 }
 0x371   : > { %v2069_v11 = vpack.c.bf16 %v1438_v47, %v1438_v47  ;;  %v1439_v61 = vmul.f32 %v2454_v49, %v2199_v5  ;;  %v1279_v6 = vpop.f32.mrb[11].mxu0  ;;  %v2458_v14 = vpop.eup %2457  ;;  %2477 = vrcp.f32 %v3502_v55 }
 0x372   : > { %v2067_v3 = vpack.c.bf16 %v1436_v52, %v1436_v52  ;;  %v1437_v50 = vmul.f32 %v2456_v58, %v1279_v6  ;;  %v2460_v46 = vpop.eup %2459  ;;  %2479 = vrcp.f32 %v3492_v43 }
 0x373   : > { %1567 = vst.msk [vmem:[%s3576_s22 + $0x8] sm:$0xf] %vm1564_vm10, %v2069_v11  ;;  %v2070_v56 = vpack.c.bf16 %v1439_v61, %v1439_v61  ;;  %v2462_v57 = vpop.eup %2461 }
 0x374   : > { %1565 = vst.msk [vmem:[%s3576_s22] sm:$0xf] %vm1564_vm10, %v2067_v3  ;;  %v2068_v4 = vpack.c.bf16 %v1437_v50, %v1437_v50  ;;  %v2464_v20 = vpop.eup %2463 }
 0x375   : > { %1568 = vst.msk [vmem:[%s3576_s22 + $0xc] sm:$0xf] %vm1564_vm10, %v2070_v56  ;;  %v2466_v0 = vpop.eup %2465 }
 0x376   : > { %1566 = vst.msk [vmem:[%s3576_s22 + $0x4] sm:$0xf] %vm1564_vm10, %v2068_v4  ;;  %v2468_v45 = vpop.eup %2467 }
 0x377   : > { %v2222_v51 = vpop.f32.mrb[8].mxu1  ;;  %v2470_v26 = vpop.eup %2469 }
 0x378   : > { %v1446_v41 = vmul.f32 %v2458_v14, %v2222_v51  ;;  %v1389_v54 = vpop.f32.mrb[9].mxu1  ;;  %v2472_v2 = vpop.eup %2471 }
 0x379   : > { %v1444_v10 = vmul.f32 %v2460_v46, %v1389_v54  ;;  %v2223_v59 = vpop.f32.mrb[10].mxu1  ;;  %v2474_v28 = vpop.eup %2473 }
 0x37a   : > { %v2077_v8 = vpack.c.bf16 %v1446_v41, %v1446_v41  ;;  %v1447_v9 = vmul.f32 %v2462_v57, %v2223_v59  ;;  %v1392_v60 = vpop.f32.mrb[11].mxu1  ;;  %v2476_v31 = vpop.eup %2475 }
 0x37b   : > { %v2075_v62 = vpack.c.bf16 %v1444_v10, %v1444_v10  ;;  %v1445_v12 = vmul.f32 %v2464_v20, %v1392_v60  ;;  %v2478_v32 = vpop.eup %2477 }
 0x37c   : > { %1575 = vst.msk [vmem:[%s3576_s22 + $0x28] sm:$0xf] %vm1564_vm10, %v2077_v8  ;;  %v2078_v25 = vpack.c.bf16 %v1447_v9, %v1447_v9  ;;  %v2480_v7 = vpop.eup %2479 }
 0x37d   : > { %1573 = vst.msk [vmem:[%s3576_s22 + $0x20] sm:$0xf] %vm1564_vm10, %v2075_v62  ;;  %v2076_v13 = vpack.c.bf16 %v1445_v12, %v1445_v12 }
 0x37e   : > { %1576 = vst.msk [vmem:[%s3576_s22 + $0x2c] sm:$0xf] %vm1564_vm10, %v2078_v25 }
 0x37f   : > { %1574 = vst.msk [vmem:[%s3576_s22 + $0x24] sm:$0xf] %vm1564_vm10, %v2076_v13  ;;  %v2202_v18 = vpop.f32.mrb[12].mxu0 }
 0x380   : > { %v1442_v1 = vmul.f32 %v2466_v0, %v2202_v18  ;;  %v1292_v33 = vpop.f32.mrb[13].mxu0 }
 0x381   : > { %v1440_v17 = vmul.f32 %v2468_v45, %v1292_v33  ;;  %v2203_v21 = vpop.f32.mrb[14].mxu0 }
 0x382   : > { %v2073_v55 = vpack.c.bf16 %v1442_v1, %v1442_v1  ;;  %v1443_v24 = vmul.f32 %v2470_v26, %v2203_v21  ;;  %v1295_v19 = vpop.f32.mrb[15].mxu0 }
 0x383   : > { %v2071_v53 = vpack.c.bf16 %v1440_v17, %v1440_v17  ;;  %v1441_v15 = vmul.f32 %v2472_v2, %v1295_v19 }
 0x384   : > { %1571 = vst.msk [vmem:[%s3576_s22 + $0x18] sm:$0xf] %vm1564_vm10, %v2073_v55  ;;  %v2074_v43 = vpack.c.bf16 %v1443_v24, %v1443_v24 }
 0x385   : > { %1569 = vst.msk [vmem:[%s3576_s22 + $0x10] sm:$0xf] %vm1564_vm10, %v2071_v53  ;;  %v2072_v48 = vpack.c.bf16 %v1441_v15, %v1441_v15 }
 0x386   : > { %1572 = vst.msk [vmem:[%s3576_s22 + $0x1c] sm:$0xf] %vm1564_vm10, %v2074_v43  ;;  %v2226_v16 = vpop.f32.mrb[12].mxu1 }
 0x387   : > { %1570 = vst.msk [vmem:[%s3576_s22 + $0x14] sm:$0xf] %vm1564_vm10, %v2072_v48  ;;  %v1450_v23 = vmul.f32 %v2474_v28, %v2226_v16  ;;  %v1405_v27 = vpop.f32.mrb[13].mxu1 }
 0x388   : > { %v1448_v37 = vmul.f32 %v2476_v31, %v1405_v27  ;;  %v2227_v30 = vpop.f32.mrb[14].mxu1 }
 0x389   : > { %v2081_v63 = vpack.c.bf16 %v1450_v23, %v1450_v23  ;;  %v1451_v22 = vmul.f32 %v2478_v32, %v2227_v30  ;;  %v1408_v29 = vpop.f32.mrb[15].mxu1 }
 0x38a   : > { %v2079_v38 = vpack.c.bf16 %v1448_v37, %v1448_v37  ;;  %v1449_v40 = vmul.f32 %v2480_v7, %v1408_v29 }
 0x38b   : > { %1579 = vst.msk [vmem:[%s3576_s22 + $0x38] sm:$0xf] %vm1564_vm10, %v2081_v63  ;;  %v2082_v42 = vpack.c.bf16 %v1451_v22, %v1451_v22 }
 0x38c   : > { %1577 = vst.msk [vmem:[%s3576_s22 + $0x30] sm:$0xf] %vm1564_vm10, %v2079_v38  ;;  %v2080_v35 = vpack.c.bf16 %v1449_v40, %v1449_v40 }
 0x38d   : > { %1580 = vst.msk [vmem:[%s3576_s22 + $0x3c] sm:$0xf] %vm1564_vm10, %v2082_v42 }
 0x38e   : > { %1578 = vst.msk [vmem:[%s3576_s22 + $0x34] sm:$0xf] %vm1564_vm10, %v2080_v35 }
 0x38f   : > { %2700 = shalt.err (!%p2697_p9)
}
 0x390   : > { %s2701_s20 = scalar_lea.hbm %s3617_s7, 1024  ;;  %s2705_s18 = scalar_lea.hbm %s3746_s10, 2048 }
 0x391   : > { %p2702_p12 = scmp.ne.s32.totalorder %s3617_s7, %s2701_s20  ;;  %p2706_p4 = scmp.lt.u32.totalorder %s3617_s7, %s3746_s10 }
 0x392   : > { %p2707_p1 = scmp.lt.u32.totalorder %s2705_s18, %s2701_s20  ;;  %p2709_p6 = scmp.lt.u32.totalorder %s2701_s20, %s3617_s7 }
 0x393   : > { %p2703_p8 = pnand %p2702_p12, %p3745_p13 }
 0x394   : > { %p2708_p0 = por %p2707_p1, %p2706_p4 }
 0x395   : > { %p2704_p7 = pneg %p2703_p8 }
 0x396   : > { %p2710_p10 = por %p2709_p6, %p2708_p0 }
 0x398   : > { %p2711_p5 = pnand %p2710_p10, %p2704_p7 }
 0x39a   : > { %2714 = shalt.err (!%p2711_p5)
}
 0x39b   : > { %s2802_s9 = smov 64   ;;  %s2803_s12 = smov 4  }
 0x39c   : > { %2258 = dma.vmem_to_hbm [thread:$0]  (%p3745_p13), %s3619_s24, 1024, %s3617_s7, %s1697_s19, %s2802_s9, %s2802_s9, %s2803_s12  }
 0x39d PF: > { %s3747_s26 = sld [smem:[#allocation22_spill]]  ;;  %s3748_s29 = sld [smem:[#allocation29_spill]] }
 0x39e   : > { %s3749_s22 = sld [smem:[#allocation25_spill]] }
 0x3a3   : > { %s1747_s8 = sand.u32 1, %s3747_s26   ;;  %p3750_p11 = scmp.ne.s32.totalorder %s3748_s29, 0 }
 0x3a4   : > { %p3751_p3 = scmp.ge.s32.totalorder %s3749_s22, 2  ;;  %s1748_s6 = scalar_lea.sflag [#allocation4], %s1747_s8 }
 0x3a6   : > { %p2283_p2 = pnand %p3751_p3, %p3750_p11 }
 0x3a8   : > { %2756 = dma.done.wait (!%p2283_p2), %s1748_s6, 1024  }
 0x3a9   : > { %2758 = vsyncadd (!%p2283_p2), %s1748_s6, 4294966272  ;;  %s1757_s1 = scalar_lea.sflag [#allocation15], %s1747_s8 }
 0x3aa   : > { %2760 = dma.done.wait (!%p2283_p2), %s1757_s1, 32  }
 0x3ab   : > { %2762 = vsyncadd (!%p2283_p2), %s1757_s1, 4294967264  ;;  %s34_s29 = sadd.s32 1, %s3749_s22   ;;  %s3752_s23 = sld [smem:[#allocation23_spill]] }
 0x3ac   : > { %p31_p9 = scmp.ge.s32.totalorder %s34_s29, 4   ;;  %s3753_s26 = sld [smem:[#allocation27_spill]] }
 0x3ad   : > { %s3754_s21 = sld [smem:[#allocation26_spill]]  ;;  %s3755_s24 = smov %s2769_s25 }
 0x3ae   : > { %s3757_s27 = smov %s2781_s28  ;;  %33 = sbr.rel (!%p31_p9) target bundleno = 18 (0x12), region = 158 }
 0x3b1   : > { %s3756_s25 = smov %s3752_s23 }
 0x3b3   : > { %s3758_s28 = smov %s3754_s21 }
 0x3b5   :  { %1762 = vsyncpa [#allocation3], 1 }
 0x3b6   :  { %1764 = vsyncpa [#allocation3 + $0x1], 1 }
 0x3b7   :  { %1765 = vsyncpa [#allocation6], 1 }
 0x3b8   :  { %1767 = vsyncpa [#allocation6 + $0x1], 1 }
 0x3b9   :  { %1768 = vsyncpa [#allocation9], 1 }
 0x3ba   :  { %1770 = vsyncpa [#allocation9 + $0x1], 1 }
 0x3bb   :  { %1771 = vsyncpa [#allocation12], 1 }
 0x3bc   :  { %1772 = vsyncpa [#allocation4], 1 }
 0x3bd   :  { %1774 = vsyncpa [#allocation4 + $0x1], 1 }
 0x3be   :  { %1775 = vsyncpa [#allocation15], 1 }
 0x3bf   :  { %1777 = vsyncpa [#allocation15 + $0x1], 1 }

</bundles_post_ra>
